<compile_context>
chip_gen: v6e
topology: v6e:2x2x1
jax: 0.10.0
libtpu: 0.0.40
codegen_flags: <defaults>
</compile_context>

<pallas_src>
import functools

import jax
import jax.numpy as jnp
from jax.experimental import pallas as pl
from jax.experimental.pallas import tpu as pltpu

EPS = 1e-5
NEG_SLOPE = -1.089
_PARITIES = ((0, 0), (0, 1), (1, 0), (1, 1))   # g = 2a + b


def _convt_bn_where_kernel(x_ref, w_ref, gamma_ref, beta_ref, o_ref,
                           *, n, hp, wp, cin, inv_cnt, row_tile):
    m = n * hp * wp
    cpad = o_ref.shape[-1]

    # ---- Pass 1: 4 parity MXU matmuls written directly to o_ref, with the
    #      BatchNorm sum / sum-of-squares folded in while the result is hot.
    s = jnp.zeros((1, cpad), jnp.float32)
    ss = jnp.zeros((1, cpad), jnp.float32)
    for g, (a, b) in enumerate(_PARITIES):
        patch = x_ref[:, a:a + hp, b:b + wp, :]        # (N, Hp, Wp, Cin) static window
        patch2d = patch.reshape(m, cin)                # tile-aligned merge (Wp % 8 == 0)
        z = jnp.dot(patch2d, w_ref[g],
                    preferred_element_type=jnp.float32)   # (M, Cpad)
        o_ref[g] = z
        s = s + jnp.sum(z, axis=0, keepdims=True)
        ss = ss + jnp.sum(z * z, axis=0, keepdims=True)

    # ---- BatchNorm2d training-mode statistics (biased variance), folded into
    #      a per-channel scale & shift.  rsqrt goes to the EUP (free slot).
    mean = s * inv_cnt
    var = ss * inv_cnt - mean * mean
    scale = gamma_ref[...] * jax.lax.rsqrt(var + EPS)
    shift = beta_ref[...] - mean * scale

    # ---- Pass 2: in-place FMA + leaky-where over o_ref, streamed in row
    #      chunks (keeps live values far under the vreg budget).  All offsets
    #      are static, lane dim stays a dense 128.
    for g in range(4):
        for r0 in range(0, m, row_tile):
            rs = min(row_tile, m - r0)
            zz = o_ref[g, pl.ds(r0, rs), :] * scale + shift
            o_ref[g, pl.ds(r0, rs), :] = jnp.where(zz > 0.0, zz, zz * NEG_SLOPE)


def model_forward(x_nchw, w_convt, gamma, beta):
    """x_nchw: (N, Cin, H, W); w_convt: (Cin, Cout, 2, 2) PyTorch layout."""
    N, Cin, H, W = x_nchw.shape
    Cout = w_convt.shape[1]
    Hp, Wp = H - 1, W - 1
    M = N * Hp * Wp
    Cpad = ((Cout + 127) // 128) * 128                 # lane-dense output width

    # In-kernel patch extraction relies on the (N,Hp,Wp,Cin)->(M,Cin) merge
    # being sublane-tile aligned; holds for the module's real input (33-1=32)
    # and for the test shape (9-1=8).
    assert Wp % 8 == 0, "W-1 must be a multiple of 8 for the in-kernel reshape"

    # ---- input glue: a single NCHW->NHWC transpose; no patch/concat copies.
    x_nhwc = jnp.transpose(x_nchw, (0, 2, 3, 1)).astype(jnp.float32)

    # ---- weights: per-parity (Cin, Cout) slices, zero-padded Cout -> Cpad.
    wmats = [w_convt[:, :, 1 - a, 1 - b] for (a, b) in _PARITIES]
    wm = jnp.stack(wmats, axis=0).astype(jnp.float32)              # (4, Cin, Cout)
    wm = jnp.pad(wm, ((0, 0), (0, 0), (0, Cpad - Cout)))           # (4, Cin, Cpad)

    gamma_p = jnp.pad(gamma.astype(jnp.float32), (0, Cpad - Cout)).reshape(1, Cpad)
    beta_p = jnp.pad(beta.astype(jnp.float32), (0, Cpad - Cout)).reshape(1, Cpad)

    kernel = functools.partial(
        _convt_bn_where_kernel,
        n=N, hp=Hp, wp=Wp, cin=Cin,
        inv_cnt=1.0 / float(4 * M), row_tile=128)

    out = pl.pallas_call(
        kernel,
        out_shape=jax.ShapeDtypeStruct((4, M, Cpad), jnp.float32),
        in_specs=[pl.BlockSpec(memory_space=pltpu.MemorySpace.VMEM)] * 4,
        out_specs=pl.BlockSpec(memory_space=pltpu.MemorySpace.VMEM),
        compiler_params=pltpu.CompilerParams(
            vmem_limit_bytes=32 * 1024 * 1024),        # explicit; above v5e default
    )(x_nhwc, wm, gamma_p, beta_p)

    # ---- output glue: one fused XLA copy does channel un-pad + parity
    #      interleave + NHWC->NCHW.
    #      out[g=2a+b, n*Hp*Wp + i*Wp + j, c] -> (n, c, 2i+a, 2j+b)
    y = out[:, :, :Cout].reshape(2, 2, N, Hp, Wp, Cout)   # (a, b, n, i, j, c)
    y = jnp.transpose(y, (2, 5, 3, 0, 4, 1))              # (n, c, i, a, j, b)
    return y.reshape(N, Cout, 2 * Hp, 2 * Wp)             # NCHW


def reference(x_nchw, w_convt, gamma, beta):
    # Pure-JAX reference: ConvTranspose2d == lhs-dilated conv with flipped kernel.
    w_oihw = jnp.flip(jnp.transpose(w_convt, (1, 0, 2, 3)), axis=(2, 3))
    z = jax.lax.conv_general_dilated(
        x_nchw, w_oihw, window_strides=(1, 1),
        padding=[(0, 0), (0, 0)], lhs_dilation=(2, 2),
        dimension_numbers=('NCHW', 'OIHW', 'NCHW'))
    mean = jnp.mean(z, axis=(0, 2, 3), keepdims=True)
    var = jnp.mean((z - mean) ** 2, axis=(0, 2, 3), keepdims=True)
    zn = (z - mean) * jax.lax.rsqrt(var + EPS)
    zn = zn * gamma.reshape(1, -1, 1, 1) + beta.reshape(1, -1, 1, 1)
    return jnp.where(zn > 0, zn, zn * NEG_SLOPE)


if __name__ == "__main__":
    N, Cin, Cout, H, W = 2, 61, 72, 9, 9   # small spatial dims; channels fixed by module

    key = jax.random.PRNGKey(0)
    kx, kw = jax.random.split(key)
    x = jax.random.normal(kx, (N, Cin, H, W), dtype=jnp.float32)
    # ConvTranspose2d weight: (in_channels, out_channels, kH, kW)
    w_convt = jax.random.normal(kw, (Cin, Cout, 2, 2), dtype=jnp.float32) * 0.1
    gamma = jnp.ones((Cout,), dtype=jnp.float32)    # BatchNorm2d default weight
    beta = jnp.zeros((Cout,), dtype=jnp.float32)    # BatchNorm2d default bias

    out = model_forward(x, w_convt, gamma, beta)
    out = jax.block_until_ready(out)

    ref = jax.block_until_ready(reference(x, w_convt, gamma, beta))
    assert out.shape == (N, Cout, 2 * H - 2, 2 * W - 2), out.shape
    max_err = float(jnp.max(jnp.abs(out - ref)))
    assert max_err < 1e-3, f"mismatch vs reference: {max_err}"

    print("KERNEL_OK")
</pallas_src>

<mosaic_0001>
module attributes {stable_mosaic.version = 11 : i64} {
  func.func @_convt_bn_where_kernel(%arg0: memref<2x9x9x61xf32, #tpu.memory_space<vmem>>, %arg1: memref<4x61x128xf32, #tpu.memory_space<vmem>>, %arg2: memref<1x128xf32, #tpu.memory_space<vmem>>, %arg3: memref<1x128xf32, #tpu.memory_space<vmem>>, %arg4: memref<4x128x128xf32, #tpu.memory_space<vmem>>) attributes {dimension_semantics = [], scalar_prefetch = 0 : i64, scratch_operands = 0 : i64, tpu.core_type = #tpu.core_type<tc>} {
    %cst = arith.constant 0.000000e+00 : f32
    %0 = vector.broadcast %cst : f32 to vector<1x128xf32>
    %cst_0 = arith.constant 0.000000e+00 : f32
    %1 = vector.broadcast %cst_0 : f32 to vector<1x128xf32>
    %c0 = arith.constant 0 : index
    %c0_1 = arith.constant 0 : index
    %c0_2 = arith.constant 0 : index
    %c0_3 = arith.constant 0 : index
    %2 = vector.load %arg0[%c0, %c0_1, %c0_2, %c0_3] : memref<2x9x9x61xf32, #tpu.memory_space<vmem>>, vector<2x8x8x61xf32>
    %3 = vector.shape_cast %2 : vector<2x8x8x61xf32> to vector<128x61xf32>
    %c0_4 = arith.constant 0 : index
    %c0_5 = arith.constant 0 : index
    %c0_6 = arith.constant 0 : index
    %4 = vector.load %arg1[%c0_4, %c0_5, %c0_6] : memref<4x61x128xf32, #tpu.memory_space<vmem>>, vector<1x61x128xf32>
    %5 = vector.shape_cast %4 : vector<1x61x128xf32> to vector<61x128xf32>
    %cst_7 = arith.constant dense<0.000000e+00> : vector<128x128xf32>
    %6 = tpu.matmul %3, %5, %cst_7 {dimension_numbers = #tpu.dot_dimension_numbers<[1], [0], [0], [1], [0, 0, 1, 1], [], []>} : vector<128x61xf32>, vector<61x128xf32>, vector<128x128xf32> -> vector<128x128xf32>
    %c0_8 = arith.constant 0 : index
    %c0_9 = arith.constant 0 : index
    %c0_10 = arith.constant 0 : index
    %7 = vector.load %arg4[%c0_8, %c0_9, %c0_10] : memref<4x128x128xf32, #tpu.memory_space<vmem>>, vector<1x128x128xf32>
    %8 = vector.shape_cast %7 : vector<1x128x128xf32> to vector<128x128xf32>
    %9 = vector.shape_cast %6 : vector<128x128xf32> to vector<1x128x128xf32>
    tpu.vector_store %arg4[%c0_8, %c0_9, %c0_10], %9 {strides = array<i32>} : memref<4x128x128xf32, #tpu.memory_space<vmem>>, vector<1x128x128xf32>,
    %cst_11 = arith.constant dense<0.000000e+00> : vector<128xf32>
    %10 = vector.multi_reduction <add>, %6, %cst_11 [0] : vector<128x128xf32> to vector<128xf32>
    %11 = vector.shape_cast %10 : vector<128xf32> to vector<1x128xf32>
    %12 = arith.addf %0, %11 : vector<1x128xf32>
    %13 = arith.mulf %6, %6 : vector<128x128xf32>
    %cst_12 = arith.constant dense<0.000000e+00> : vector<128xf32>
    %14 = vector.multi_reduction <add>, %13, %cst_12 [0] : vector<128x128xf32> to vector<128xf32>
    %15 = vector.shape_cast %14 : vector<128xf32> to vector<1x128xf32>
    %16 = arith.addf %1, %15 : vector<1x128xf32>
    %c0_13 = arith.constant 0 : index
    %c0_14 = arith.constant 0 : index
    %c1 = arith.constant 1 : index
    %c0_15 = arith.constant 0 : index
    %17 = vector.load %arg0[%c0_13, %c0_14, %c1, %c0_15] : memref<2x9x9x61xf32, #tpu.memory_space<vmem>>, vector<2x8x8x61xf32>
    %18 = vector.shape_cast %17 : vector<2x8x8x61xf32> to vector<128x61xf32>
    %c1_16 = arith.constant 1 : index
    %c0_17 = arith.constant 0 : index
    %c0_18 = arith.constant 0 : index
    %19 = vector.load %arg1[%c1_16, %c0_17, %c0_18] : memref<4x61x128xf32, #tpu.memory_space<vmem>>, vector<1x61x128xf32>
    %20 = vector.shape_cast %19 : vector<1x61x128xf32> to vector<61x128xf32>
    %cst_19 = arith.constant dense<0.000000e+00> : vector<128x128xf32>
    %21 = tpu.matmul %18, %20, %cst_19 {dimension_numbers = #tpu.dot_dimension_numbers<[1], [0], [0], [1], [0, 0, 1, 1], [], []>} : vector<128x61xf32>, vector<61x128xf32>, vector<128x128xf32> -> vector<128x128xf32>
    %c1_20 = arith.constant 1 : index
    %c0_21 = arith.constant 0 : index
    %c0_22 = arith.constant 0 : index
    %22 = vector.load %arg4[%c1_20, %c0_21, %c0_22] : memref<4x128x128xf32, #tpu.memory_space<vmem>>, vector<1x128x128xf32>
    %23 = vector.shape_cast %22 : vector<1x128x128xf32> to vector<128x128xf32>
    %24 = vector.shape_cast %21 : vector<128x128xf32> to vector<1x128x128xf32>
    tpu.vector_store %arg4[%c1_20, %c0_21, %c0_22], %24 {strides = array<i32>} : memref<4x128x128xf32, #tpu.memory_space<vmem>>, vector<1x128x128xf32>,
    %cst_23 = arith.constant dense<0.000000e+00> : vector<128xf32>
    %25 = vector.multi_reduction <add>, %21, %cst_23 [0] : vector<128x128xf32> to vector<128xf32>
    %26 = vector.shape_cast %25 : vector<128xf32> to vector<1x128xf32>
    %27 = arith.addf %12, %26 : vector<1x128xf32>
    %28 = arith.mulf %21, %21 : vector<128x128xf32>
    %cst_24 = arith.constant dense<0.000000e+00> : vector<128xf32>
    %29 = vector.multi_reduction <add>, %28, %cst_24 [0] : vector<128x128xf32> to vector<128xf32>
    %30 = vector.shape_cast %29 : vector<128xf32> to vector<1x128xf32>
    %31 = arith.addf %16, %30 : vector<1x128xf32>
    %c0_25 = arith.constant 0 : index
    %c1_26 = arith.constant 1 : index
    %c0_27 = arith.constant 0 : index
    %c0_28 = arith.constant 0 : index
    %32 = vector.load %arg0[%c0_25, %c1_26, %c0_27, %c0_28] : memref<2x9x9x61xf32, #tpu.memory_space<vmem>>, vector<2x8x8x61xf32>
    %33 = vector.shape_cast %32 : vector<2x8x8x61xf32> to vector<128x61xf32>
    %c2 = arith.constant 2 : index
    %c0_29 = arith.constant 0 : index
    %c0_30 = arith.constant 0 : index
    %34 = vector.load %arg1[%c2, %c0_29, %c0_30] : memref<4x61x128xf32, #tpu.memory_space<vmem>>, vector<1x61x128xf32>
    %35 = vector.shape_cast %34 : vector<1x61x128xf32> to vector<61x128xf32>
    %cst_31 = arith.constant dense<0.000000e+00> : vector<128x128xf32>
    %36 = tpu.matmul %33, %35, %cst_31 {dimension_numbers = #tpu.dot_dimension_numbers<[1], [0], [0], [1], [0, 0, 1, 1], [], []>} : vector<128x61xf32>, vector<61x128xf32>, vector<128x128xf32> -> vector<128x128xf32>
    %c2_32 = arith.constant 2 : index
    %c0_33 = arith.constant 0 : index
    %c0_34 = arith.constant 0 : index
    %37 = vector.load %arg4[%c2_32, %c0_33, %c0_34] : memref<4x128x128xf32, #tpu.memory_space<vmem>>, vector<1x128x128xf32>
    %38 = vector.shape_cast %37 : vector<1x128x128xf32> to vector<128x128xf32>
    %39 = vector.shape_cast %36 : vector<128x128xf32> to vector<1x128x128xf32>
    tpu.vector_store %arg4[%c2_32, %c0_33, %c0_34], %39 {strides = array<i32>} : memref<4x128x128xf32, #tpu.memory_space<vmem>>, vector<1x128x128xf32>,
    %cst_35 = arith.constant dense<0.000000e+00> : vector<128xf32>
    %40 = vector.multi_reduction <add>, %36, %cst_35 [0] : vector<128x128xf32> to vector<128xf32>
    %41 = vector.shape_cast %40 : vector<128xf32> to vector<1x128xf32>
    %42 = arith.addf %27, %41 : vector<1x128xf32>
    %43 = arith.mulf %36, %36 : vector<128x128xf32>
    %cst_36 = arith.constant dense<0.000000e+00> : vector<128xf32>
    %44 = vector.multi_reduction <add>, %43, %cst_36 [0] : vector<128x128xf32> to vector<128xf32>
    %45 = vector.shape_cast %44 : vector<128xf32> to vector<1x128xf32>
    %46 = arith.addf %31, %45 : vector<1x128xf32>
    %c0_37 = arith.constant 0 : index
    %c1_38 = arith.constant 1 : index
    %c1_39 = arith.constant 1 : index
    %c0_40 = arith.constant 0 : index
    %47 = vector.load %arg0[%c0_37, %c1_38, %c1_39, %c0_40] : memref<2x9x9x61xf32, #tpu.memory_space<vmem>>, vector<2x8x8x61xf32>
    %48 = vector.shape_cast %47 : vector<2x8x8x61xf32> to vector<128x61xf32>
    %c3 = arith.constant 3 : index
    %c0_41 = arith.constant 0 : index
    %c0_42 = arith.constant 0 : index
    %49 = vector.load %arg1[%c3, %c0_41, %c0_42] : memref<4x61x128xf32, #tpu.memory_space<vmem>>, vector<1x61x128xf32>
    %50 = vector.shape_cast %49 : vector<1x61x128xf32> to vector<61x128xf32>
    %cst_43 = arith.constant dense<0.000000e+00> : vector<128x128xf32>
    %51 = tpu.matmul %48, %50, %cst_43 {dimension_numbers = #tpu.dot_dimension_numbers<[1], [0], [0], [1], [0, 0, 1, 1], [], []>} : vector<128x61xf32>, vector<61x128xf32>, vector<128x128xf32> -> vector<128x128xf32>
    %c3_44 = arith.constant 3 : index
    %c0_45 = arith.constant 0 : index
    %c0_46 = arith.constant 0 : index
    %52 = vector.load %arg4[%c3_44, %c0_45, %c0_46] : memref<4x128x128xf32, #tpu.memory_space<vmem>>, vector<1x128x128xf32>
    %53 = vector.shape_cast %52 : vector<1x128x128xf32> to vector<128x128xf32>
    %54 = vector.shape_cast %51 : vector<128x128xf32> to vector<1x128x128xf32>
    tpu.vector_store %arg4[%c3_44, %c0_45, %c0_46], %54 {strides = array<i32>} : memref<4x128x128xf32, #tpu.memory_space<vmem>>, vector<1x128x128xf32>,
    %cst_47 = arith.constant dense<0.000000e+00> : vector<128xf32>
    %55 = vector.multi_reduction <add>, %51, %cst_47 [0] : vector<128x128xf32> to vector<128xf32>
    %56 = vector.shape_cast %55 : vector<128xf32> to vector<1x128xf32>
    %57 = arith.addf %42, %56 : vector<1x128xf32>
    %58 = arith.mulf %51, %51 : vector<128x128xf32>
    %cst_48 = arith.constant dense<0.000000e+00> : vector<128xf32>
    %59 = vector.multi_reduction <add>, %58, %cst_48 [0] : vector<128x128xf32> to vector<128xf32>
    %60 = vector.shape_cast %59 : vector<128xf32> to vector<1x128xf32>
    %61 = arith.addf %46, %60 : vector<1x128xf32>
    %cst_49 = arith.constant 0.001953125 : f32
    %62 = vector.broadcast %cst_49 : f32 to vector<1x128xf32>
    %63 = arith.mulf %57, %62 : vector<1x128xf32>
    %cst_50 = arith.constant 0.001953125 : f32
    %64 = vector.broadcast %cst_50 : f32 to vector<1x128xf32>
    %65 = arith.mulf %61, %64 : vector<1x128xf32>
    %66 = arith.mulf %63, %63 : vector<1x128xf32>
    %67 = arith.subf %65, %66 : vector<1x128xf32>
    %c0_51 = arith.constant 0 : index
    %c0_52 = arith.constant 0 : index
    %68 = vector.load %arg2[%c0_51, %c0_52] : memref<1x128xf32, #tpu.memory_space<vmem>>, vector<1x128xf32>
    %cst_53 = arith.constant 9.99999974E-6 : f32
    %69 = vector.broadcast %cst_53 : f32 to vector<1x128xf32>
    %70 = arith.addf %67, %69 : vector<1x128xf32>
    %71 = math.rsqrt %70 : vector<1x128xf32>
    %72 = arith.mulf %68, %71 : vector<1x128xf32>
    %c0_54 = arith.constant 0 : index
    %c0_55 = arith.constant 0 : index
    %73 = vector.load %arg3[%c0_54, %c0_55] : memref<1x128xf32, #tpu.memory_space<vmem>>, vector<1x128xf32>
    %74 = arith.mulf %63, %72 : vector<1x128xf32>
    %75 = arith.subf %73, %74 : vector<1x128xf32>
    %c0_56 = arith.constant 0 : index
    %c0_57 = arith.constant 0 : index
    %c0_58 = arith.constant 0 : index
    %76 = vector.load %arg4[%c0_56, %c0_57, %c0_58] : memref<4x128x128xf32, #tpu.memory_space<vmem>>, vector<1x128x128xf32>
    %77 = vector.shape_cast %76 : vector<1x128x128xf32> to vector<128x128xf32>
    %78 = vector.broadcast %72 : vector<1x128xf32> to vector<128x128xf32>
    %79 = arith.mulf %77, %78 : vector<128x128xf32>
    %80 = vector.broadcast %75 : vector<1x128xf32> to vector<128x128xf32>
    %81 = arith.addf %79, %80 : vector<128x128xf32>
    %cst_59 = arith.constant 0.000000e+00 : f32
    %82 = vector.broadcast %cst_59 : f32 to vector<128x128xf32>
    %83 = arith.cmpf ogt, %81, %82 : vector<128x128xf32>
    %cst_60 = arith.constant -1.089000e+00 : f32
    %84 = vector.broadcast %cst_60 : f32 to vector<128x128xf32>
    %85 = arith.mulf %81, %84 : vector<128x128xf32>
    %86 = arith.select %83, %81, %85 : vector<128x128xi1>, vector<128x128xf32>
    %c0_61 = arith.constant 0 : index
    %c0_62 = arith.constant 0 : index
    %c0_63 = arith.constant 0 : index
    %87 = vector.load %arg4[%c0_61, %c0_62, %c0_63] : memref<4x128x128xf32, #tpu.memory_space<vmem>>, vector<1x128x128xf32>
    %88 = vector.shape_cast %87 : vector<1x128x128xf32> to vector<128x128xf32>
    %89 = vector.shape_cast %86 : vector<128x128xf32> to vector<1x128x128xf32>
    tpu.vector_store %arg4[%c0_61, %c0_62, %c0_63], %89 {strides = array<i32>} : memref<4x128x128xf32, #tpu.memory_space<vmem>>, vector<1x128x128xf32>,
    %c1_64 = arith.constant 1 : index
    %c0_65 = arith.constant 0 : index
    %c0_66 = arith.constant 0 : index
    %90 = vector.load %arg4[%c1_64, %c0_65, %c0_66] : memref<4x128x128xf32, #tpu.memory_space<vmem>>, vector<1x128x128xf32>
    %91 = vector.shape_cast %90 : vector<1x128x128xf32> to vector<128x128xf32>
    %92 = vector.broadcast %72 : vector<1x128xf32> to vector<128x128xf32>
    %93 = arith.mulf %91, %92 : vector<128x128xf32>
    %94 = vector.broadcast %75 : vector<1x128xf32> to vector<128x128xf32>
    %95 = arith.addf %93, %94 : vector<128x128xf32>
    %cst_67 = arith.constant 0.000000e+00 : f32
    %96 = vector.broadcast %cst_67 : f32 to vector<128x128xf32>
    %97 = arith.cmpf ogt, %95, %96 : vector<128x128xf32>
    %cst_68 = arith.constant -1.089000e+00 : f32
    %98 = vector.broadcast %cst_68 : f32 to vector<128x128xf32>
    %99 = arith.mulf %95, %98 : vector<128x128xf32>
    %100 = arith.select %97, %95, %99 : vector<128x128xi1>, vector<128x128xf32>
    %c1_69 = arith.constant 1 : index
    %c0_70 = arith.constant 0 : index
    %c0_71 = arith.constant 0 : index
    %101 = vector.load %arg4[%c1_69, %c0_70, %c0_71] : memref<4x128x128xf32, #tpu.memory_space<vmem>>, vector<1x128x128xf32>
    %102 = vector.shape_cast %101 : vector<1x128x128xf32> to vector<128x128xf32>
    %103 = vector.shape_cast %100 : vector<128x128xf32> to vector<1x128x128xf32>
    tpu.vector_store %arg4[%c1_69, %c0_70, %c0_71], %103 {strides = array<i32>} : memref<4x128x128xf32, #tpu.memory_space<vmem>>, vector<1x128x128xf32>,
    %c2_72 = arith.constant 2 : index
    %c0_73 = arith.constant 0 : index
    %c0_74 = arith.constant 0 : index
    %104 = vector.load %arg4[%c2_72, %c0_73, %c0_74] : memref<4x128x128xf32, #tpu.memory_space<vmem>>, vector<1x128x128xf32>
    %105 = vector.shape_cast %104 : vector<1x128x128xf32> to vector<128x128xf32>
    %106 = vector.broadcast %72 : vector<1x128xf32> to vector<128x128xf32>
    %107 = arith.mulf %105, %106 : vector<128x128xf32>
    %108 = vector.broadcast %75 : vector<1x128xf32> to vector<128x128xf32>
    %109 = arith.addf %107, %108 : vector<128x128xf32>
    %cst_75 = arith.constant 0.000000e+00 : f32
    %110 = vector.broadcast %cst_75 : f32 to vector<128x128xf32>
    %111 = arith.cmpf ogt, %109, %110 : vector<128x128xf32>
    %cst_76 = arith.constant -1.089000e+00 : f32
    %112 = vector.broadcast %cst_76 : f32 to vector<128x128xf32>
    %113 = arith.mulf %109, %112 : vector<128x128xf32>
    %114 = arith.select %111, %109, %113 : vector<128x128xi1>, vector<128x128xf32>
    %c2_77 = arith.constant 2 : index
    %c0_78 = arith.constant 0 : index
    %c0_79 = arith.constant 0 : index
    %115 = vector.load %arg4[%c2_77, %c0_78, %c0_79] : memref<4x128x128xf32, #tpu.memory_space<vmem>>, vector<1x128x128xf32>
    %116 = vector.shape_cast %115 : vector<1x128x128xf32> to vector<128x128xf32>
    %117 = vector.shape_cast %114 : vector<128x128xf32> to vector<1x128x128xf32>
    tpu.vector_store %arg4[%c2_77, %c0_78, %c0_79], %117 {strides = array<i32>} : memref<4x128x128xf32, #tpu.memory_space<vmem>>, vector<1x128x128xf32>,
    %c3_80 = arith.constant 3 : index
    %c0_81 = arith.constant 0 : index
    %c0_82 = arith.constant 0 : index
    %118 = vector.load %arg4[%c3_80, %c0_81, %c0_82] : memref<4x128x128xf32, #tpu.memory_space<vmem>>, vector<1x128x128xf32>
    %119 = vector.shape_cast %118 : vector<1x128x128xf32> to vector<128x128xf32>
    %120 = vector.broadcast %72 : vector<1x128xf32> to vector<128x128xf32>
    %121 = arith.mulf %119, %120 : vector<128x128xf32>
    %122 = vector.broadcast %75 : vector<1x128xf32> to vector<128x128xf32>
    %123 = arith.addf %121, %122 : vector<128x128xf32>
    %cst_83 = arith.constant 0.000000e+00 : f32
    %124 = vector.broadcast %cst_83 : f32 to vector<128x128xf32>
    %125 = arith.cmpf ogt, %123, %124 : vector<128x128xf32>
    %cst_84 = arith.constant -1.089000e+00 : f32
    %126 = vector.broadcast %cst_84 : f32 to vector<128x128xf32>
    %127 = arith.mulf %123, %126 : vector<128x128xf32>
    %128 = arith.select %125, %123, %127 : vector<128x128xi1>, vector<128x128xf32>
    %c3_85 = arith.constant 3 : index
    %c0_86 = arith.constant 0 : index
    %c0_87 = arith.constant 0 : index
    %129 = vector.load %arg4[%c3_85, %c0_86, %c0_87] : memref<4x128x128xf32, #tpu.memory_space<vmem>>, vector<1x128x128xf32>
    %130 = vector.shape_cast %129 : vector<1x128x128xf32> to vector<128x128xf32>
    %131 = vector.shape_cast %128 : vector<128x128xf32> to vector<1x128x128xf32>
    tpu.vector_store %arg4[%c3_85, %c0_86, %c0_87], %131 {strides = array<i32>} : memref<4x128x128xf32, #tpu.memory_space<vmem>>, vector<1x128x128xf32>,
    return
  }
}

</mosaic_0001>

<bundles_post_ra>
// kernel: tpu_custom_call.1
= control target key start
LH: loop header
LB: loop body
LE: loop exit
PB: predicated region body
PF: predicated region fallthrough
CT: control target
= control target key end

     0   :  { %vm91_vm0 = vcmask 1044480   ;;  %vm42_vm1 = vcmask 498688   ;;  %s3291_s0 = inlined_call_operand.vmem [shape: f32[2,9,9,61], index: 0, kind: input, shape index: {}]   ;;  %s3292_s1 = inlined_call_operand.vmem [shape: f32[4,61,128], index: 1, kind: input, shape index: {}]   ;;  %s3293_s2 = inlined_call_operand.vmem [shape: f32[1,128], index: 2, kind: input, shape index: {}]   ;;  %s3294_s3 = inlined_call_operand.vmem [shape: f32[1,128], index: 3, kind: input, shape index: {}]   ;;  %s3295_s4 = inlined_call_operand.hbm [shape: f32[4,128,128], index: 4, kind: output, shape index: {}]  }
   0x1   :  { %v41_v0 = vld [vmem:[%s3292_s1 + $0x38] sm:$0x1f]  ;;  %v40_v2 = vld [vmem:[%s3292_s1 + $0x30] sm:$0xff]  ;;  %v39_v4 = vld [vmem:[%s3292_s1 + $0x28] sm:$0xff] }
   0x2   :  { %v1722_v1 = vld [vmem:[%s3292_s1 + $0x78] sm:$0x1f]  ;;  %1918 = vmatprep.subr.msk.mxu0 %vm91_vm0, %v41_v0  ;;  %v1721_v3 = vld [vmem:[%s3292_s1 + $0x70] sm:$0xff]  ;;  %v1720_v5 = vld [vmem:[%s3292_s1 + $0x68] sm:$0xff] }
   0x3   :  { %1958 = vmatprep.subr.msk.mxu1 %vm91_vm0, %v1722_v1  ;;  %1919 = vmatpush3.msk.msra.mxu0 %vm91_vm0, %v41_v0  ;;  %v38_v6 = vld [vmem:[%s3292_s1 + $0x20] sm:$0xff]  ;;  %v37_v8 = vld [vmem:[%s3292_s1 + $0x18] sm:$0xff]  ;;  %v36_v10 = vld [vmem:[%s3292_s1 + $0x10] sm:$0xff] }
   0x4   :  { %1959 = vmatpush3.msk.msra.mxu1 %vm91_vm0, %v1722_v1  ;;  %1920 = vmatprep.subr.mxu0 %v40_v2  ;;  %v1719_v7 = vld [vmem:[%s3292_s1 + $0x60] sm:$0xff]  ;;  %v1718_v9 = vld [vmem:[%s3292_s1 + $0x58] sm:$0xff]  ;;  %v1717_v11 = vld [vmem:[%s3292_s1 + $0x50] sm:$0xff] }
   0x5   :  { %1960 = vmatprep.subr.mxu1 %v1721_v3  ;;  %1921 = vmatpush3.msra.mxu0 %v40_v2  ;;  %v35_v12 = vld [vmem:[%s3292_s1 + $0x8] sm:$0xff]  ;;  %v34_v14 = vld [vmem:[%s3292_s1] sm:$0xff]  ;;  %v2194_v18 = vld [vmem:[%s3291_s0 + $0x10] sm:$0xff] }
   0x6   :  { %1961 = vmatpush3.msra.mxu1 %v1721_v3  ;;  %1922 = vmatprep.subr.mxu0 %v39_v4  ;;  %v1716_v13 = vld [vmem:[%s3292_s1 + $0x48] sm:$0xff]  ;;  %v1715_v15 = vld [vmem:[%s3292_s1 + $0x40] sm:$0xff]  ;;  %v2199_v19 = vld [vmem:[%s3291_s0 + $0x11] sm:$0xff] }
   0x7   :  { %1962 = vmatprep.subr.mxu1 %v1720_v5  ;;  %1923 = vmatpush3.msra.mxu0 %v39_v4  ;;  %v18_v16 = vld [vmem:[%s3291_s0] sm:$0xff]  ;;  %v1763_v20 = vld [vmem:[%s3292_s1 + $0xb8] sm:$0x1f]  ;;  %v2228_v24 = vld [vmem:[%s3291_s0 + $0x30] sm:$0xff] }
   0x8   :  { %1963 = vmatpush3.msra.mxu1 %v1720_v5  ;;  %1924 = vmatprep.subr.mxu0 %v38_v6  ;;  %v316_v17 = vld [vmem:[%s3291_s0 + $0x1] sm:$0xff]  ;;  %v1804_v21 = vld [vmem:[%s3292_s1 + $0xf8] sm:$0x1f]  ;;  %v1762_v26 = vld [vmem:[%s3292_s1 + $0xb0] sm:$0xff] }
   0x9   :  { %1964 = vmatprep.subr.mxu1 %v1719_v7  ;;  %1925 = vmatpush3.msra.mxu0 %v38_v6  ;;  %v2212_v22 = vld [vmem:[%s3291_s0 + $0x20] sm:$0xff]  ;;  %v2233_v25 = vld [vmem:[%s3291_s0 + $0x31] sm:$0xff] }
   0xa   :  { %1965 = vmatpush3.msra.mxu1 %v1719_v7  ;;  %1926 = vmatprep.subr.mxu0 %v37_v8  ;;  %v2221_v23 = vld [vmem:[%s3291_s0 + $0x21] sm:$0xff]  ;;  %v1803_v27 = vld [vmem:[%s3292_s1 + $0xf0] sm:$0xff] }
   0xb   :  { %1966 = vmatprep.subr.mxu1 %v1718_v9  ;;  %1927 = vmatpush3.msra.mxu0 %v37_v8  ;;  %v2250_v28 = vld [vmem:[%s3291_s0 + $0x40] sm:$0xff] }
   0xc   :  { %1967 = vmatpush3.msra.mxu1 %v1718_v9  ;;  %1928 = vmatprep.subr.mxu0 %v36_v10  ;;  %v2259_v29 = vld [vmem:[%s3291_s0 + $0x41] sm:$0xff] }
   0xd   :  { %1968 = vmatprep.subr.mxu1 %v1717_v11  ;;  %1929 = vmatpush3.msra.mxu0 %v36_v10 }
   0xe   :  { %1969 = vmatpush3.msra.mxu1 %v1717_v11  ;;  %1930 = vmatprep.subr.mxu0 %v35_v12 }
   0xf   :  { %1970 = vmatprep.subr.mxu1 %v1716_v13  ;;  %1931 = vmatpush3.msra.mxu0 %v35_v12 }
  0x10   :  { %1971 = vmatpush3.msra.mxu1 %v1716_v13  ;;  %1932 = vmatprep.subr.mxu0 %v34_v14 }
  0x11   :  { %1972 = vmatprep.subr.mxu1 %v1715_v15  ;;  %1933 = vmatpush3.msra.mxu0 %v34_v14 }
  0x12   :  { %1934 = vmatprep.mubr.msk.f32.mxu0 %vm42_vm1, %v18_v16  ;;  %1973 = vmatpush3.msra.mxu1 %v1715_v15 }
  0x13   :  { %1974 = vmatprep.mubr.msk.f32.mxu1 %vm42_vm1, %v316_v17  ;;  %1935 = vmatmul.mubr.msk.f32.vlgmr.msra.gmra.mxu0 %vm42_vm1, %v2194_v18 }
  0x14   :  { %1975 = vmatmul.mubr.msk.f32.vlgmr.msra.gmra.mxu1 %vm42_vm1, %v2199_v19  ;;  %1998 = vmatprep.subr.msk.mxu0 %vm91_vm0, %v1763_v20 }
  0x15   :  { %2038 = vmatprep.subr.msk.mxu1 %vm91_vm0, %v1804_v21  ;;  %1999 = vmatpush3.msk.msra.mxu0 %vm91_vm0, %v1763_v20 }
  0x16   :  { %1937 = vmatprep.mubr.msk.f32.mxu0 %vm42_vm1, %v2212_v22  ;;  %1977 = vmatprep.mubr.msk.f32.mxu1 %vm42_vm1, %v2221_v23 }
  0x17   :  { %2039 = vmatpush3.msk.msra.mxu1 %vm91_vm0, %v1804_v21  ;;  %1938 = vmatmul.mubr.msk.f32.gmra.mxu0 %vm42_vm1, %v2228_v24 }
  0x18   :  { %1978 = vmatmul.mubr.msk.f32.gmra.mxu1 %vm42_vm1, %v2233_v25 }
  0x19   :  { %9 = vsyncpa [#allocation3], 0  ;;  %2000 = vmatprep.subr.mxu0 %v1762_v26  ;;  %2040 = vmatprep.subr.mxu1 %v1803_v27  ;;  %v2264_v30 = vld [vmem:[%s3291_s0 + $0x50] sm:$0xff]  ;;  %v1761_v32 = vld [vmem:[%s3292_s1 + $0xa8] sm:$0xff] }
  0x1a   :  { %v2269_v31 = vld [vmem:[%s3291_s0 + $0x51] sm:$0xff]  ;;  %2001 = vmatpush3.msra.mxu0 %v1762_v26  ;;  %1940 = vmatprep.mubr.msk.f32.mxu0 %vm42_vm1, %v2250_v28  ;;  %v1802_v33 = vld [vmem:[%s3292_s1 + $0xe8] sm:$0xff]  ;;  %v2284_v34 = vld [vmem:[%s3291_s0 + $0x60] sm:$0xff] }
  0x1b   :  { %1980 = vmatprep.mubr.msk.f32.mxu1 %vm42_vm1, %v2259_v29  ;;  %2041 = vmatpush3.msra.mxu1 %v1803_v27  ;;  %v2293_v35 = vld [vmem:[%s3291_s0 + $0x61] sm:$0xff]  ;;  %v2298_v36 = vld [vmem:[%s3291_s0 + $0x70] sm:$0xff]  ;;  %v1759_v44 = vld [vmem:[%s3292_s1 + $0x98] sm:$0xff] }
  0x1c   :  { %1941 = vmatmul.mubr.msk.f32.gmra.mxu0 %vm42_vm1, %v2264_v30  ;;  %1981 = vmatmul.mubr.msk.f32.gmra.mxu1 %vm42_vm1, %v2269_v31  ;;  %v2303_v37 = vld [vmem:[%s3291_s0 + $0x71] sm:$0xff]  ;;  %v1760_v38 = vld [vmem:[%s3292_s1 + $0xa0] sm:$0xff]  ;;  %v1757_v56 = vld [vmem:[%s3292_s1 + $0x88] sm:$0xff] }
  0x1d   :  { %2002 = vmatprep.subr.mxu0 %v1761_v32  ;;  %2042 = vmatprep.subr.mxu1 %v1802_v33  ;;  %v1801_v39 = vld [vmem:[%s3292_s1 + $0xe0] sm:$0xff]  ;;  %v26_v40 = vld [vmem:[%s3291_s0 + $0x90] sm:$0xff]  ;;  %v1800_v45 = vld [vmem:[%s3292_s1 + $0xd8] sm:$0xff] }
  0x1e   :  { %2003 = vmatpush3.msra.mxu0 %v1761_v32  ;;  %1943 = vmatprep.mubr.msk.f32.mxu0 %vm42_vm1, %v2284_v34  ;;  %v324_v41 = vld [vmem:[%s3291_s0 + $0x91] sm:$0xff]  ;;  %v2328_v42 = vld [vmem:[%s3291_s0 + $0xa0] sm:$0xff]  ;;  %v1798_v57 = vld [vmem:[%s3292_s1 + $0xc8] sm:$0xff] }
  0x1f   :  { %1983 = vmatprep.mubr.msk.f32.mxu1 %vm42_vm1, %v2293_v35  ;;  %2043 = vmatpush3.msra.mxu1 %v1802_v33  ;;  %v2333_v43 = vld [vmem:[%s3291_s0 + $0xa1] sm:$0xff]  ;;  %v2346_v46 = vld [vmem:[%s3291_s0 + $0xb0] sm:$0xff] }
  0x20   :  { %1944 = vmatmul.mubr.msk.f32.gmra.mxu0 %vm42_vm1, %v2298_v36  ;;  %1984 = vmatmul.mubr.msk.f32.gmra.mxu1 %vm42_vm1, %v2303_v37  ;;  %v2355_v47 = vld [vmem:[%s3291_s0 + $0xb1] sm:$0xff]  ;;  %v2360_v48 = vld [vmem:[%s3291_s0 + $0xc0] sm:$0xff] }
  0x21   :  { %2004 = vmatprep.subr.mxu0 %v1760_v38  ;;  %2044 = vmatprep.subr.mxu1 %v1801_v39  ;;  %v2365_v49 = vld [vmem:[%s3291_s0 + $0xc1] sm:$0xff]  ;;  %v1758_v50 = vld [vmem:[%s3292_s1 + $0x90] sm:$0xff] }
  0x22   :  { %2005 = vmatpush3.msra.mxu0 %v1760_v38  ;;  %1946 = vmatprep.mubr.msk.f32.mxu0 %vm42_vm1, %v26_v40  ;;  %v1799_v51 = vld [vmem:[%s3292_s1 + $0xd0] sm:$0xff]  ;;  %v31_v54 = vld [vmem:[%s3291_s0 + $0xe0] sm:$0xff] }
  0x23   :  { %1986 = vmatprep.mubr.msk.f32.mxu1 %vm42_vm1, %v324_v41  ;;  %2045 = vmatpush3.msra.mxu1 %v1801_v39  ;;  %v30_v52 = vld [vmem:[%s3291_s0 + $0xd0] sm:$0xff]  ;;  %v329_v55 = vld [vmem:[%s3291_s0 + $0xe1] sm:$0xff] }
  0x24   :  { %1947 = vmatmul.mubr.msk.f32.gmra.mxu0 %vm42_vm1, %v2328_v42  ;;  %1987 = vmatmul.mubr.msk.f32.gmra.mxu1 %vm42_vm1, %v2333_v43  ;;  %v328_v53 = vld [vmem:[%s3291_s0 + $0xd1] sm:$0xff]  ;;  %v33_v60 = vld [vmem:[%s3291_s0 + $0x100] sm:$0xff] }
  0x25   :  { %2006 = vmatprep.subr.mxu0 %v1759_v44  ;;  %2046 = vmatprep.subr.mxu1 %v1800_v45  ;;  %v32_v58 = vld [vmem:[%s3291_s0 + $0xf0] sm:$0xff]  ;;  %v331_v61 = vld [vmem:[%s3291_s0 + $0x101] sm:$0xff] }
  0x26   :  { %2007 = vmatpush3.msra.mxu0 %v1759_v44  ;;  %1949 = vmatprep.mubr.msk.f32.mxu0 %vm42_vm1, %v2346_v46  ;;  %v330_v59 = vld [vmem:[%s3291_s0 + $0xf1] sm:$0xff]  ;;  %v1756_v62 = vld [vmem:[%s3292_s1 + $0x80] sm:$0xff] }
  0x27   :  { %1989 = vmatprep.mubr.msk.f32.mxu1 %vm42_vm1, %v2355_v47  ;;  %2047 = vmatpush3.msra.mxu1 %v1800_v45  ;;  %v1797_v63 = vld [vmem:[%s3292_s1 + $0xc0] sm:$0xff]  ;;  %v1755_v2 = vld [vmem:[%s3291_s0 + $0x110] sm:$0xff] }
  0x28   :  { %1950 = vmatmul.mubr.msk.f32.gmra.mxu0 %vm42_vm1, %v2360_v48  ;;  %1990 = vmatmul.mubr.msk.f32.gmra.mxu1 %vm42_vm1, %v2365_v49  ;;  %v1747_v0 = vld [vmem:[%s3291_s0 + $0x80] sm:$0xff]  ;;  %v1796_v3 = vld [vmem:[%s3291_s0 + $0x111] sm:$0xff] }
  0x29   :  { %2008 = vmatprep.subr.mxu0 %v1758_v50  ;;  %2048 = vmatprep.subr.mxu1 %v1799_v51  ;;  %v1788_v1 = vld [vmem:[%s3291_s0 + $0x81] sm:$0xff] }
  0x2a   :  { %2009 = vmatpush3.msra.mxu0 %v1758_v50  ;;  %1952 = vmatprep.mubr.msk.f32.mxu0 %vm42_vm1, %v30_v52 }
  0x2b   :  { %1992 = vmatprep.mubr.msk.f32.mxu1 %vm42_vm1, %v328_v53  ;;  %2049 = vmatpush3.msra.mxu1 %v1799_v51 }
  0x2c   :  { %1953 = vmatmul.mubr.msk.f32.gmra.mxu0 %vm42_vm1, %v31_v54  ;;  %1993 = vmatmul.mubr.msk.f32.gmra.mxu1 %vm42_vm1, %v329_v55 }
  0x2d   :  { %2010 = vmatprep.subr.mxu0 %v1757_v56  ;;  %2050 = vmatprep.subr.mxu1 %v1798_v57 }
  0x2e   :  { %2011 = vmatpush3.msra.mxu0 %v1757_v56  ;;  %1955 = vmatprep.mubr.msk.f32.mxu0 %vm42_vm1, %v32_v58 }
  0x2f   :  { %1995 = vmatprep.mubr.msk.f32.mxu1 %vm42_vm1, %v330_v59  ;;  %2051 = vmatpush3.msra.mxu1 %v1798_v57 }
  0x30   :  { %1956 = vmatmul.mubr.msk.f32.gmra.mxu0 %vm42_vm1, %v33_v60  ;;  %1996 = vmatmul.mubr.msk.f32.gmra.mxu1 %vm42_vm1, %v331_v61 }
  0x31   :  { %2012 = vmatprep.subr.mxu0 %v1756_v62  ;;  %2052 = vmatprep.subr.mxu1 %v1797_v63 }
  0x32   :  { %2013 = vmatpush3.msra.mxu0 %v1756_v62  ;;  %2014 = vmatprep.mubr.msk.f32.mxu0 %vm42_vm1, %v2194_v18 }
  0x33   :  { %2053 = vmatpush3.msra.mxu1 %v1797_v63  ;;  %2054 = vmatprep.mubr.msk.f32.mxu1 %vm42_vm1, %v2199_v19 }
  0x34   :  { %2015 = vmatmul.mubr.msk.f32.vlgmr.msra.gmra.mxu0 %vm42_vm1, %v2212_v22  ;;  %2055 = vmatmul.mubr.msk.f32.vlgmr.msra.gmra.mxu1 %vm42_vm1, %v2221_v23 }
  0x35   :  { %2017 = vmatprep.mubr.msk.f32.mxu0 %vm42_vm1, %v2228_v24  ;;  %2057 = vmatprep.mubr.msk.f32.mxu1 %vm42_vm1, %v2233_v25 }
  0x38   :  { %2018 = vmatmul.mubr.msk.f32.gmra.mxu0 %vm42_vm1, %v2250_v28  ;;  %2058 = vmatmul.mubr.msk.f32.gmra.mxu1 %vm42_vm1, %v2259_v29 }
  0x39   :  { %2020 = vmatprep.mubr.msk.f32.mxu0 %vm42_vm1, %v2264_v30  ;;  %2060 = vmatprep.mubr.msk.f32.mxu1 %vm42_vm1, %v2269_v31 }
  0x3c   :  { %2021 = vmatmul.mubr.msk.f32.gmra.mxu0 %vm42_vm1, %v2284_v34  ;;  %2061 = vmatmul.mubr.msk.f32.gmra.mxu1 %vm42_vm1, %v2293_v35 }
  0x3d   :  { %2023 = vmatprep.mubr.msk.f32.mxu0 %vm42_vm1, %v2298_v36  ;;  %2063 = vmatprep.mubr.msk.f32.mxu1 %vm42_vm1, %v2303_v37 }
  0x40   :  { %2024 = vmatmul.mubr.msk.f32.gmra.mxu0 %vm42_vm1, %v1747_v0  ;;  %2064 = vmatmul.mubr.msk.f32.gmra.mxu1 %vm42_vm1, %v1788_v1 }
  0x41   :  { %2026 = vmatprep.mubr.msk.f32.mxu0 %vm42_vm1, %v2328_v42  ;;  %2066 = vmatprep.mubr.msk.f32.mxu1 %vm42_vm1, %v2333_v43 }
  0x44   :  { %2027 = vmatmul.mubr.msk.f32.gmra.mxu0 %vm42_vm1, %v2346_v46  ;;  %2067 = vmatmul.mubr.msk.f32.gmra.mxu1 %vm42_vm1, %v2355_v47 }
  0x45   :  { %2029 = vmatprep.mubr.msk.f32.mxu0 %vm42_vm1, %v2360_v48  ;;  %2069 = vmatprep.mubr.msk.f32.mxu1 %vm42_vm1, %v2365_v49 }
  0x48   :  { %2030 = vmatmul.mubr.msk.f32.gmra.mxu0 %vm42_vm1, %v30_v52  ;;  %2070 = vmatmul.mubr.msk.f32.gmra.mxu1 %vm42_vm1, %v328_v53 }
  0x49   :  { %2032 = vmatprep.mubr.msk.f32.mxu0 %vm42_vm1, %v31_v54  ;;  %2072 = vmatprep.mubr.msk.f32.mxu1 %vm42_vm1, %v329_v55 }
  0x4c   :  { %2033 = vmatmul.mubr.msk.f32.gmra.mxu0 %vm42_vm1, %v32_v58  ;;  %2073 = vmatmul.mubr.msk.f32.gmra.mxu1 %vm42_vm1, %v330_v59 }
  0x4d   :  { %2035 = vmatprep.mubr.msk.f32.mxu0 %vm42_vm1, %v33_v60  ;;  %2075 = vmatprep.mubr.msk.f32.mxu1 %vm42_vm1, %v331_v61 }
  0x50   :  { %2036 = vmatmul.mubr.msk.f32.gmra.mxu0 %vm42_vm1, %v1755_v2  ;;  %2076 = vmatmul.mubr.msk.f32.gmra.mxu1 %vm42_vm1, %v1796_v3 }
  0xd3   :  { %v2489_v4 = vpop.f32.mrf.mxu0 }
  0xd4   :  { %v2491_v5 = vpop.f32.mrf.mxu1  ;;  %v279_v11 = vmul.f32 %v2489_v4, %v2489_v4 }
  0xd5   :  { %v577_v6 = vmul.f32 %v2491_v5, %v2491_v5  ;;  %v2495_v7 = vpop.f32.mrf.mxu0 }
  0xd6   :  { %v2497_v8 = vpop.f32.mrf.mxu1  ;;  %v278_v9 = vmul.f32 %v2495_v7, %v2495_v7  ;;  %v256_v14 = vadd.f32 %v2489_v4, %v2495_v7 }
  0xd7   :  { %v576_v10 = vmul.f32 %v2497_v8, %v2497_v8  ;;  %v2505_v12 = vpop.f32.mrf.mxu0  ;;  %v554_v15 = vadd.f32 %v2491_v5, %v2497_v8 }
  0xd8   :  { %v2507_v13 = vpop.f32.mrf.mxu1  ;;  %v294_v16 = vadd.f32 %v279_v11, %v278_v9  ;;  %v281_v26 = vmul.f32 %v2505_v12, %v2505_v12 }
  0xd9   :  { %v592_v17 = vadd.f32 %v577_v6, %v576_v10  ;;  %v2513_v18 = vpop.f32.mrf.mxu0  ;;  %v579_v27 = vmul.f32 %v2507_v13, %v2507_v13 }
  0xda   :  { %v2515_v19 = vpop.f32.mrf.mxu1  ;;  %v257_v20 = vadd.f32 %v256_v14, %v2513_v18  ;;  %v280_v21 = vmul.f32 %v2513_v18, %v2513_v18 }
  0xdb   :  { %v555_v22 = vadd.f32 %v554_v15, %v2515_v19  ;;  %v578_v23 = vmul.f32 %v2515_v19, %v2515_v19 }
  0xdc   :  { %v2523_v24 = vpop.f32.mrf.mxu0  ;;  %v2525_v25 = vpop.f32.mrf.mxu1  ;;  %v295_v28 = vadd.f32 %v294_v16, %v280_v21  ;;  %v258_v31 = vadd.f32 %v2505_v12, %v257_v20 }
  0xdd   :  { %v593_v29 = vadd.f32 %v592_v17, %v578_v23  ;;  %v556_v33 = vadd.f32 %v2507_v13, %v555_v22  ;;  %v283_v42 = vmul.f32 %v2523_v24, %v2523_v24  ;;  %v581_v43 = vmul.f32 %v2525_v25, %v2525_v25 }
  0xde   :  { %v2531_v30 = vpop.f32.mrf.mxu0  ;;  %v2534_v32 = vpop.f32.mrf.mxu1  ;;  %v296_v35 = vadd.f32 %v295_v28, %v281_v26 }
  0xdf   :  { %v282_v34 = vmul.f32 %v2531_v30, %v2531_v30  ;;  %v580_v36 = vmul.f32 %v2534_v32, %v2534_v32  ;;  %v594_v37 = vadd.f32 %v593_v29, %v579_v27  ;;  %v259_v38 = vadd.f32 %v258_v31, %v2531_v30 }
  0xe0   :  { %v557_v39 = vadd.f32 %v556_v33, %v2534_v32  ;;  %v2543_v40 = vpop.f32.mrf.mxu0  ;;  %v2545_v41 = vpop.f32.mrf.mxu1 }
  0xe1   :  { %v297_v44 = vadd.f32 %v296_v35, %v282_v34  ;;  %v595_v45 = vadd.f32 %v594_v37, %v580_v36  ;;  %v260_v47 = vadd.f32 %v2523_v24, %v259_v38  ;;  %v285_v58 = vmul.f32 %v2543_v40, %v2543_v40 }
  0xe2   :  { %v2551_v46 = vpop.f32.mrf.mxu0  ;;  %v2554_v48 = vpop.f32.mrf.mxu1  ;;  %v558_v49 = vadd.f32 %v2525_v25, %v557_v39  ;;  %v583_v61 = vmul.f32 %v2545_v41, %v2545_v41 }
  0xe3   :  { %v284_v50 = vmul.f32 %v2551_v46, %v2551_v46  ;;  %v298_v51 = vadd.f32 %v297_v44, %v283_v42  ;;  %v582_v52 = vmul.f32 %v2554_v48, %v2554_v48  ;;  %v596_v53 = vadd.f32 %v595_v45, %v581_v43 }
  0xe4   :  { %v261_v54 = vadd.f32 %v260_v47, %v2551_v46  ;;  %v559_v55 = vadd.f32 %v558_v49, %v2554_v48  ;;  %v2563_v56 = vpop.f32.mrf.mxu0  ;;  %v2565_v57 = vpop.f32.mrf.mxu1 }
  0xe5   :  { %v299_v59 = vadd.f32 %v298_v51, %v284_v50  ;;  %v597_v60 = vadd.f32 %v596_v53, %v582_v52  ;;  %v287_v21 = vmul.f32 %v2563_v56, %v2563_v56  ;;  %v585_v28 = vmul.f32 %v2565_v57, %v2565_v57 }
  0xe6   :  { %v2571_v62 = vpop.f32.mrf.mxu0  ;;  %v262_v63 = vadd.f32 %v2543_v40, %v261_v54  ;;  %v2574_v0 = vpop.f32.mrf.mxu1  ;;  %v560_v1 = vadd.f32 %v2545_v41, %v559_v55 }
  0xe7   :  { %v286_v2 = vmul.f32 %v2571_v62, %v2571_v62  ;;  %v300_v3 = vadd.f32 %v299_v59, %v285_v58  ;;  %v584_v9 = vmul.f32 %v2574_v0, %v2574_v0  ;;  %v598_v10 = vadd.f32 %v597_v60, %v583_v61 }
  0xe8   :  { %v263_v6 = vadd.f32 %v262_v63, %v2571_v62  ;;  %v2582_v11 = vpop.f32.mrf.mxu0  ;;  %v2584_v14 = vpop.f32.mrf.mxu1  ;;  %v561_v16 = vadd.f32 %v560_v1, %v2574_v0 }
  0xe9   :  { %3332 = vst [vmem:[#allocation5_spill] sm:$0xff] %v2584_v14  ;;  %v301_v15 = vadd.f32 %v300_v3, %v286_v2  ;;  %v599_v22 = vadd.f32 %v598_v10, %v584_v9  ;;  %v289_v49 = vmul.f32 %v2582_v11, %v2582_v11  ;;  %v587_v54 = vmul.f32 %v2584_v14, %v2584_v14 }
  0xea   :  { %v2587_v17 = vpop.f32.mrf.mxu0  ;;  %v2589_v20 = vpop.f32.mrf.mxu1  ;;  %v264_v23 = vadd.f32 %v2563_v56, %v263_v6  ;;  %v562_v33 = vadd.f32 %v2565_v57, %v561_v16 }
  0xeb   :  { %v288_v29 = vmul.f32 %v2587_v17, %v2587_v17  ;;  %v302_v31 = vadd.f32 %v301_v15, %v287_v21  ;;  %v586_v37 = vmul.f32 %v2589_v20, %v2589_v20  ;;  %v600_v38 = vadd.f32 %v599_v22, %v585_v28 }
  0xec   :  { %v2594_v26 = vpop.f32.mrf.mxu0  ;;  %v2596_v27 = vpop.f32.mrf.mxu1  ;;  %v265_v36 = vadd.f32 %v264_v23, %v2587_v17  ;;  %v563_v44 = vadd.f32 %v562_v33, %v2589_v20 }
  0xed   :  { %3333 = vst [vmem:[#allocation6_spill] sm:$0xff] %v2596_v27  ;;  %v303_v43 = vadd.f32 %v302_v31, %v288_v29  ;;  %v601_v50 = vadd.f32 %v600_v38, %v586_v37  ;;  %v291_v33 = vmul.f32 %v2594_v26, %v2594_v26 }
  0xee   :  { %v2603_v34 = vpop.f32.mrf.mxu0  ;;  %v2605_v35 = vpop.f32.mrf.mxu1  ;;  %v266_v51 = vadd.f32 %v2582_v11, %v265_v36  ;;  %v564_v59 = vadd.f32 %v2584_v14, %v563_v44 }
  0xef   :  { %3334 = vst [vmem:[#allocation7_spill] sm:$0xff] %v2605_v35  ;;  %v290_v55 = vmul.f32 %v2603_v34, %v2603_v34  ;;  %v304_v58 = vadd.f32 %v303_v43, %v289_v49  ;;  %v588_v2 = vmul.f32 %v2605_v35, %v2605_v35  ;;  %v602_v3 = vadd.f32 %v601_v50, %v587_v54 }
  0xf0   :  { %v2610_v39 = vpop.f32.mrf.mxu0  ;;  %v2612_v42 = vpop.f32.mrf.mxu1  ;;  %v267_v1 = vadd.f32 %v266_v51, %v2603_v34  ;;  %v565_v23 = vadd.f32 %v564_v59, %v2605_v35 }
  0xf1   :  { %3335 = vst [vmem:[#allocation8_spill] sm:$0xff] %v2612_v42  ;;  %v305_v22 = vadd.f32 %v304_v58, %v290_v55  ;;  %v603_v43 = vadd.f32 %v602_v3, %v588_v2  ;;  %v589_v55 = vmul.f32 %v2596_v27, %v2596_v27 }
  0xf2   :  { %v2615_v45 = vpop.f32.mrf.mxu0  ;;  %v2617_v47 = vpop.f32.mrf.mxu1  ;;  %v268_v44 = vadd.f32 %v2594_v26, %v267_v1  ;;  %v566_v1 = vadd.f32 %v2596_v27, %v565_v23 }
  0xf3   :  { %3336 = vst [vmem:[#allocation9_spill] sm:$0xff] %v2617_v47  ;;  %v306_v2 = vadd.f32 %v305_v22, %v291_v33  ;;  %v604_v33 = vadd.f32 %v603_v43, %v589_v55 }
  0xf4   :  { %v2622_v52 = vpop.f32.mrf.mxu0  ;;  %v2624_v53 = vpop.f32.mrf.mxu1  ;;  %v269_v22 = vadd.f32 %v268_v44, %v2615_v45  ;;  %v567_v43 = vadd.f32 %v566_v1, %v2617_v47 }
  0xf5   :  { %3337 = vst [vmem:[#allocation10_spill] sm:$0xff] %v2622_v52  ;;  %3338 = vst [vmem:[#allocation11_spill] sm:$0xff] %v2624_v53  ;;  %v876_v10 = vmul.f32 %v2622_v52, %v2622_v52  ;;  %v1174_v15 = vmul.f32 %v2624_v53, %v2624_v53 }
  0xf6   :  { %v2631_v60 = vpop.f32.mrf.mxu0  ;;  %v2633_v61 = vpop.f32.mrf.mxu1 }
  0xf7   :  { %3339 = vst [vmem:[#allocation12_spill] sm:$0xff] %v2631_v60  ;;  %3340 = vst [vmem:[#allocation13_spill] sm:$0xff] %v2633_v61  ;;  %v875_v63 = vmul.f32 %v2631_v60, %v2631_v60  ;;  %v853_v16 = vadd.f32 %v2622_v52, %v2631_v60  ;;  %v1173_v21 = vmul.f32 %v2633_v61, %v2633_v61 }
  0xf8   :  { %v2640_v6 = vpop.f32.mrf.mxu0  ;;  %v2642_v9 = vpop.f32.mrf.mxu1  ;;  %v1151_v28 = vadd.f32 %v2624_v53, %v2633_v61 }
  0xf9   :  { %3341 = vst [vmem:[#allocation14_spill] sm:$0xff] %v2640_v6  ;;  %3342 = vst [vmem:[#allocation15_spill] sm:$0xff] %v2642_v9  ;;  %v891_v36 = vadd.f32 %v876_v10, %v875_v63  ;;  %v1189_v58 = vadd.f32 %v1174_v15, %v1173_v21  ;;  %v292_v63 = vmul.f32 %v2615_v45, %v2615_v45 }
  0xfa   :  { %v2655_v29 = vpop.f32.mrf.mxu0  ;;  %v2657_v31 = vpop.f32.mrf.mxu1  ;;  %v878_v3 = vmul.f32 %v2640_v6, %v2640_v6  ;;  %v1176_v61 = vmul.f32 %v2642_v9, %v2642_v9 }
  0xfb   :  { %3343 = vst [vmem:[#allocation16_spill] sm:$0xff] %v2655_v29  ;;  %3344 = vst [vmem:[#allocation17_spill] sm:$0xff] %v2657_v31  ;;  %v854_v37 = vadd.f32 %v853_v16, %v2655_v29  ;;  %v877_v38 = vmul.f32 %v2655_v29, %v2655_v29  ;;  %v1152_v49 = vadd.f32 %v1151_v28, %v2657_v31 }
  0xfc   :  { %v1175_v50 = vmul.f32 %v2657_v31, %v2657_v31  ;;  %v2668_v51 = vpop.f32.mrf.mxu0  ;;  %v2670_v54 = vpop.f32.mrf.mxu1  ;;  %v590_v28 = vmul.f32 %v2617_v47, %v2617_v47 }
  0xfd   :  { %3345 = vst [vmem:[#allocation18_spill] sm:$0xff] %v2668_v51  ;;  %3346 = vst [vmem:[#allocation19_spill] sm:$0xff] %v2670_v54  ;;  %v892_v59 = vadd.f32 %v891_v36, %v877_v38  ;;  %v855_v15 = vadd.f32 %v2640_v6, %v854_v37  ;;  %v1153_v36 = vadd.f32 %v2642_v9, %v1152_v49 }
  0xfe   :  { %v2679_v10 = vpop.f32.mrf.mxu0  ;;  %v2681_v16 = vpop.f32.mrf.mxu1  ;;  %v1190_v31 = vadd.f32 %v1189_v58, %v1175_v50  ;;  %v293_v58 = vmul.f32 %v2610_v39, %v2610_v39  ;;  %v307_v9 = vadd.f32 %v306_v2, %v292_v63  ;;  %v270_v6 = vadd.f32 %v2610_v39, %v269_v22 }
  0xff   :  { %3347 = vst [vmem:[#allocation20_spill] sm:$0xff] %v2679_v10  ;;  %3348 = vst [vmem:[#allocation21_spill] sm:$0xff] %v2681_v16  ;;  %v879_v21 = vmul.f32 %v2679_v10, %v2679_v10  ;;  %v893_v23 = vadd.f32 %v892_v59, %v878_v3  ;;  %v856_v50 = vadd.f32 %v855_v15, %v2679_v10 }
 0x100   :  { %v2690_v38 = vpop.f32.mrf.mxu0  ;;  %v2692_v53 = vpop.f32.mrf.mxu1  ;;  %v1177_v37 = vmul.f32 %v2681_v16, %v2681_v16  ;;  %v1154_v49 = vadd.f32 %v1153_v36, %v2681_v16  ;;  %v591_v3 = vmul.f32 %v2612_v42, %v2612_v42  ;;  %v880_v15 = vmul.f32 %v2668_v51, %v2668_v51 }
 0x101   :  { %3349 = vst [vmem:[#allocation22_spill] sm:$0xff] %v2690_v38  ;;  %3350 = vst [vmem:[#allocation23_spill] sm:$0xff] %v2692_v53  ;;  %v894_v44 = vadd.f32 %v893_v23, %v879_v21  ;;  %v1191_v10 = vadd.f32 %v1190_v31, %v1176_v61  ;;  %v605_v29 = vadd.f32 %v604_v33, %v590_v28 }
 0x102   :  { %v2703_v55 = vpop.f32.mrf.mxu0  ;;  %v2705_v59 = vpop.f32.mrf.mxu1  ;;  %v857_v1 = vadd.f32 %v2668_v51, %v856_v50  ;;  %v1178_v16 = vmul.f32 %v2670_v54, %v2670_v54  ;;  %v1155_v52 = vadd.f32 %v2670_v54, %v1154_v49  ;;  %v568_v61 = vadd.f32 %v2612_v42, %v567_v43 }
 0x103   :  { %3351 = vst [vmem:[#allocation24_spill] sm:$0xff] %v2703_v55  ;;  %3352 = vst [vmem:[#allocation25_spill] sm:$0xff] %v2705_v59  ;;  %v881_v21 = vmul.f32 %v2703_v55, %v2703_v55  ;;  %v1192_v63 = vadd.f32 %v1191_v10, %v1177_v37  ;;  %v895_v2 = vadd.f32 %v894_v44, %v880_v15 }
 0x104   :  { %v2715_v23 = vpop.f32.mrf.mxu0  ;;  %v2717_v36 = vpop.f32.mrf.mxu1  ;;  %v882_v31 = vmul.f32 %v2690_v38, %v2690_v38  ;;  %v858_v28 = vadd.f32 %v857_v1, %v2703_v55  ;;  %v1179_v22 = vmul.f32 %v2705_v59, %v2705_v59  ;;  %v1156_v10 = vadd.f32 %v1155_v52, %v2705_v59 }
 0x105   :  { %3353 = vst [vmem:[#allocation26_spill] sm:$0xff] %v2715_v23  ;;  %3354 = vst [vmem:[#allocation27_spill] sm:$0xff] %v2717_v36  ;;  %v896_v51 = vadd.f32 %v895_v2, %v881_v21  ;;  %v1193_v37 = vadd.f32 %v1192_v63, %v1178_v16  ;;  %v308_v43 = vadd.f32 %v307_v9, %v293_v58  ;;  %v271_v16 = vrot.slane %v270_v6, 4 }
 0x106   :  { %v2728_v33 = vpop.f32.mrf.mxu0  ;;  %v2730_v50 = vpop.f32.mrf.mxu1  ;;  %v606_v49 = vadd.f32 %v605_v29, %v591_v3  ;;  %v1180_v15 = vmul.f32 %v2692_v53, %v2692_v53  ;;  %v859_v1 = vadd.f32 %v2690_v38, %v858_v28  ;;  %v1157_v21 = vadd.f32 %v2692_v53, %v1156_v10 }
 0x107   :  { %3355 = vst [vmem:[#allocation28_spill] sm:$0xff] %v2728_v33  ;;  %3356 = vst [vmem:[#allocation29_spill] sm:$0xff] %v2730_v50  ;;  %v883_v44 = vmul.f32 %v2728_v33, %v2728_v33  ;;  %v1194_v60 = vadd.f32 %v1193_v37, %v1179_v22  ;;  %v897_v42 = vadd.f32 %v896_v51, %v882_v31  ;;  %v569_v63 = vrot.slane %v568_v61, 4 }
 0x108   :  { %v2738_v54 = vpop.f32.mrf.mxu0  ;;  %v2740_v55 = vpop.f32.mrf.mxu1  ;;  %v1181_v52 = vmul.f32 %v2730_v50, %v2730_v50  ;;  %v884_v9 = vmul.f32 %v2715_v23, %v2715_v23  ;;  %v860_v29 = vadd.f32 %v859_v1, %v2728_v33  ;;  %v1158_v28 = vadd.f32 %v1157_v21, %v2730_v50 }
 0x109   :  { %3357 = vst [vmem:[#allocation30_spill] sm:$0xff] %v2738_v54  ;;  %3358 = vst [vmem:[#allocation31_spill] sm:$0xff] %v2740_v55  ;;  %v898_v2 = vadd.f32 %v897_v42, %v883_v44  ;;  %v1195_v51 = vadd.f32 %v1194_v60, %v1180_v15  ;;  %v309_v22 = vrot.slane %v308_v43, 4  ;;  %v607_v10 = vrot.slane %v606_v49, 4 }
 0x10a   :  { %v2748_v58 = vpop.f32.mrf.mxu0  ;;  %v2750_v3 = vpop.f32.mrf.mxu1  ;;  %v1182_v37 = vmul.f32 %v2717_v36, %v2717_v36  ;;  %v861_v53 = vadd.f32 %v2715_v23, %v860_v29  ;;  %v1159_v42 = vadd.f32 %v2717_v36, %v1158_v28  ;;  %v272_v44 = vadd.f32 %v271_v16, %v270_v6 }
 0x10b   :  { %3359 = vst [vmem:[#allocation32_spill] sm:$0xff] %v2748_v58  ;;  %3360 = vst [vmem:[#allocation33_spill] sm:$0xff] %v2750_v3  ;;  %v885_v31 = vmul.f32 %v2748_v58, %v2748_v58  ;;  %v1196_v33 = vadd.f32 %v1195_v51, %v1181_v52  ;;  %v899_v38 = vadd.f32 %v898_v2, %v884_v9 }
 0x10c   :  { %v2758_v59 = vpop.f32.mrf.mxu0  ;;  %v2760_v1 = vpop.f32.mrf.mxu1  ;;  %v1183_v60 = vmul.f32 %v2750_v3, %v2750_v3  ;;  %v570_v15 = vadd.f32 %v569_v63, %v568_v61  ;;  %v886_v21 = vmul.f32 %v2738_v54, %v2738_v54  ;;  %v862_v50 = vadd.f32 %v861_v53, %v2748_v58 }
 0x10d   :  { %3361 = vst [vmem:[#allocation34_spill] sm:$0xff] %v2758_v59  ;;  %3362 = vst [vmem:[#allocation35_spill] sm:$0xff] %v2760_v1  ;;  %v900_v23 = vadd.f32 %v899_v38, %v885_v31  ;;  %v1160_v52 = vadd.f32 %v1159_v42, %v2750_v3  ;;  %v1197_v9 = vadd.f32 %v1196_v33, %v1182_v37  ;;  %v273_v31 = vrot.slane %v272_v44, 2 }
 0x10e   :  { %v2768_v47 = vpop.f32.mrf.mxu0  ;;  %v2770_v29 = vpop.f32.mrf.mxu1  ;;  %v310_v28 = vadd.f32 %v309_v22, %v308_v43  ;;  %v608_v51 = vadd.f32 %v607_v10, %v606_v49  ;;  %v1184_v6 = vmul.f32 %v2740_v55, %v2740_v55  ;;  %v863_v61 = vadd.f32 %v2738_v54, %v862_v50 }
 0x10f   :  { %3363 = vst [vmem:[#allocation36_spill] sm:$0xff] %v2768_v47  ;;  %3364 = vst [vmem:[#allocation37_spill] sm:$0xff] %v2770_v29  ;;  %v887_v2 = vmul.f32 %v2768_v47, %v2768_v47  ;;  %v1198_v63 = vadd.f32 %v1197_v9, %v1183_v60  ;;  %v901_v36 = vadd.f32 %v900_v23, %v886_v21  ;;  %v571_v37 = vrot.slane %v570_v15, 2 }
 0x110   :  { %v2778_v16 = vpop.f32.mrf.mxu0  ;;  %v2780_v53 = vpop.f32.mrf.mxu1  ;;  %v1161_v38 = vadd.f32 %v2740_v55, %v1160_v52  ;;  %v1185_v33 = vmul.f32 %v2770_v29, %v2770_v29  ;;  %v888_v43 = vmul.f32 %v2758_v59, %v2758_v59  ;;  %v864_v49 = vadd.f32 %v863_v61, %v2768_v47 }
 0x111   :  { %3365 = vst [vmem:[#allocation38_spill] sm:$0xff] %v2778_v16  ;;  %3366 = vst [vmem:[#allocation39_spill] sm:$0xff] %v2780_v53  ;;  %v902_v10 = vadd.f32 %v901_v36, %v887_v2  ;;  %v1199_v23 = vadd.f32 %v1198_v63, %v1184_v6  ;;  %v311_v21 = vrot.slane %v310_v28, 2  ;;  %v609_v52 = vrot.slane %v608_v51, 2 }
 0x112   :  { %v2788_v22 = vpop.f32.mrf.mxu0  ;;  %v2790_v50 = vpop.f32.mrf.mxu1  ;;  %v1162_v42 = vadd.f32 %v1161_v38, %v2770_v29  ;;  %v1186_v9 = vmul.f32 %v2760_v1, %v2760_v1  ;;  %v865_v55 = vadd.f32 %v2758_v59, %v864_v49  ;;  %v274_v2 = vadd.f32 %v273_v31, %v272_v44 }
 0x113   :  { %3367 = vst [vmem:[#allocation40_spill] sm:$0xff] %v2788_v22  ;;  %v889_v60 = vmul.f32 %v2788_v22, %v2788_v22  ;;  %v1200_v3 = vadd.f32 %v1199_v23, %v1185_v33  ;;  %v903_v61 = vadd.f32 %v902_v10, %v888_v43  ;;  %v1187_v36 = vmul.f32 %v2790_v50, %v2790_v50 }
 0x114   :  { %v1163_v47 = vadd.f32 %v2760_v1, %v1162_v42  ;;  %v866_v6 = vadd.f32 %v865_v55, %v2788_v22  ;;  %v890_v63 = vmul.f32 %v2778_v16, %v2778_v16  ;;  %v312_v58 = vadd.f32 %v311_v21, %v310_v28 }
 0x115   :  { %v904_v38 = vadd.f32 %v903_v61, %v889_v60  ;;  %v1201_v54 = vadd.f32 %v1200_v3, %v1186_v9  ;;  %v572_v27 = vadd.f32 %v571_v37, %v570_v15  ;;  %v610_v49 = vadd.f32 %v609_v52, %v608_v51 }
 0x116   :  { %v1164_v29 = vadd.f32 %v1163_v47, %v2790_v50  ;;  %v867_v33 = vadd.f32 %v2778_v16, %v866_v6  ;;  %v1188_v43 = vmul.f32 %v2780_v53, %v2780_v53  ;;  %v275_v60 = vrot.slane %v274_v2, 1 }
 0x117   :  { %v905_v10 = vadd.f32 %v904_v38, %v890_v63  ;;  %v1202_v31 = vadd.f32 %v1201_v54, %v1187_v36  ;;  %v313_v61 = vrot.slane %v312_v58, 1  ;;  %v573_v47 = vrot.slane %v572_v27, 1 }
 0x118   :  { %v1165_v44 = vadd.f32 %v2780_v53, %v1164_v29  ;;  %v868_v55 = vrot.slane %v867_v33, 4  ;;  %v611_v28 = vrot.slane %v610_v49, 1  ;;  %v276_v63 = vadd.f32 %v275_v60, %v274_v2 }
 0x119   :  { %v906_v42 = vrot.slane %v905_v10, 4  ;;  %v1203_v1 = vadd.f32 %v1202_v31, %v1188_v43  ;;  %v314_v38 = vadd.f32 %v313_v61, %v312_v58  ;;  %v574_v29 = vadd.f32 %v573_v47, %v572_v27 }
 0x11a   :  { %v1166_v23 = vrot.slane %v1165_v44, 4  ;;  %v869_v3 = vadd.f32 %v868_v55, %v867_v33  ;;  %v612_v36 = vadd.f32 %v611_v28, %v610_v49  ;;  %v1239_v28 = vlaneseq }
 0x11b   :  { %v907_v15 = vadd.f32 %v906_v42, %v905_v10  ;;  %v1204_v37 = vrot.slane %v1203_v1, 4  ;;  %v575_v55 = vadd.f32 %v574_v29, %v276_v63 }
 0x11c   :  { %v1167_v51 = vadd.f32 %v1166_v23, %v1165_v44  ;;  %v870_v21 = vrot.slane %v869_v3, 2  ;;  %v613_v44 = vadd.f32 %v612_v36, %v314_v38 }
 0x11d   :  { %v908_v52 = vrot.slane %v907_v15, 2  ;;  %v1205_v6 = vadd.f32 %v1204_v37, %v1203_v1 }
 0x11e   :  { %v1168_v9 = vrot.slane %v1167_v51, 2  ;;  %v871_v54 = vadd.f32 %v870_v21, %v869_v3 }
 0x11f   :  { %v909_v53 = vadd.f32 %v908_v52, %v907_v15  ;;  %v1206_v43 = vrot.slane %v1205_v6, 2  ;;  %v1240_v15 = vshrl.u32 %v1239_v28, 7  ;;  %v3379_v28 = vld [vmem:[#allocation24_spill] sm:$0xff] }
 0x120   :  { %v1169_v16 = vadd.f32 %v1168_v9, %v1167_v51  ;;  %v872_v31 = vrot.slane %v871_v54, 1  ;;  %v1215_v51 = vld [vmem:[%s3293_s2] sm:$0x1]  ;;  %s2105_s2 = smov [#allocation2]  }
 0x121   :  { %v910_v22 = vrot.slane %v909_v53, 1  ;;  %v1207_v33 = vadd.f32 %v1206_v43, %v1205_v6 }
 0x122   :  { %v1170_v59 = vrot.slane %v1169_v16, 1  ;;  %v873_v10 = vadd.f32 %v872_v31, %v871_v54  ;;  %v3369_v31 = vld [vmem:[#allocation7_spill] sm:$0xff] }
 0x123   :  { %v911_v42 = vadd.f32 %v910_v22, %v909_v53  ;;  %v1208_v23 = vrot.slane %v1207_v33, 1  ;;  %v1241_v53 = vsub.s32 0, %v1240_v15 }
 0x124   :  { %v874_v35 = vadd.f32 %v873_v10, %v575_v55  ;;  %v1171_v14 = vadd.f32 %v1170_v59, %v1169_v16 }
 0x125   :  { %v912_v1 = vadd.f32 %v911_v42, %v613_v44  ;;  %v1209_v2 = vadd.f32 %v1208_v23, %v1207_v33  ;;  %v3373_v44 = vld [vmem:[#allocation12_spill] sm:$0xff]  ;;  %v3374_v23 = vld [vmem:[#allocation10_spill] sm:$0xff] }
 0x126   :  { %v1172_v58 = vadd.f32 %v1171_v14, %v874_v35  ;;  %v1219_v14 = vld [vmem:[%s3294_s3] sm:$0x1]  ;;  %s1687_s3 = sshll.u32 %s2105_s2, 4  ;;  %s3273_s3 = int_to_ptr.vmem [resolvable:$true] %s1687_s3 }
 0x127   :  { %v1210_v27 = vadd.f32 %v1209_v2, %v912_v1  ;;  %v3375_v2 = vld [vmem:[#allocation16_spill] sm:$0xff]  ;;  %s2083_s23 = scalar_lea.vmem %s3273_s3, 8192  ;;  %p2088_p1 = scmp.lt.s32.totalorder %s3273_s3, %s3273_s3 }
 0x128   :  { %v1211_v60 = vmul.f32 0.001953125, %v1172_v58  ;;  %p2084_p0 = scmp.ne.s32.totalorder %s3273_s3, %s2083_s23  ;;  %p2089_p2 = scmp.lt.s32.totalorder %s2083_s23, %s2083_s23 }
 0x129   :  { %v1212_v49 = vmul.f32 0.001953125, %v1210_v27  ;;  %v3376_v27 = vld [vmem:[#allocation14_spill] sm:$0xff] }
 0x12a   :  { %v1213_v61 = vmul.f32 %v1211_v60, %v1211_v60  ;;  %p2090_p3 = por %p2089_p2, %p2088_p1 }
 0x12c   :  { %v1214_v47 = vsub.f32 %v1212_v49, %v1213_v61  ;;  %v3377_v49 = vld [vmem:[#allocation20_spill] sm:$0xff]  ;;  %p2091_p4 = pnand %p2090_p3, %p2084_p0 }
 0x12e   :  { %v1216_v3 = vadd.f32 1e-05, %v1214_v47  ;;  %v3378_v47 = vld [vmem:[#allocation18_spill] sm:$0xff] }
 0x130   :  { %2081 = vrsqrt.f32 %v1216_v3 }
 0x13d   :  { %v2082_v22 = vpop.eup %2081 }
 0x13e   :  { %v1218_v37 = vmul.f32 %v2082_v22, %v1215_v51  ;;  %v3380_v51 = vld [vmem:[#allocation22_spill] sm:$0xff]  ;;  %v3381_v22 = vld [vmem:[#allocation28_spill] sm:$0xff] }
 0x140   :  { %v1220_v35 = vmul.f32 %v1218_v37, %v1211_v60  ;;  %v2815_v59 = vrot.slane %v1218_v37, %v1241_v53 }
 0x142   :  { %v1221_v16 = vsub.f32 %v1219_v14, %v1220_v35  ;;  %v1600_v21 = vmul.f32 %v2815_v59, %v2790_v50  ;;  %v2821_v52 = vmul.f32 %v2815_v59, %v2495_v7  ;;  %v2825_v9 = vmul.f32 %v2489_v4, %v2815_v59  ;;  %v3382_v14 = vld [vmem:[#allocation26_spill] sm:$0xff] }
 0x143   :  { %v2829_v6 = vmul.f32 %v2815_v59, %v2513_v18  ;;  %v2833_v63 = vmul.f32 %v2505_v12, %v2815_v59  ;;  %v2837_v38 = vmul.f32 %v2815_v59, %v2531_v30  ;;  %v2841_v7 = vmul.f32 %v2523_v24, %v2815_v59 }
 0x144   :  { %v2843_v50 = vrot.slane %v1221_v16, %v1241_v53  ;;  %v2847_v4 = vmul.f32 %v2815_v59, %v2551_v46  ;;  %v2851_v18 = vmul.f32 %v2543_v40, %v2815_v59  ;;  %v2855_v12 = vmul.f32 %v2815_v59, %v2571_v62  ;;  %v3383_v16 = vld [vmem:[#allocation32_spill] sm:$0xff] }
 0x145   :  { %v2859_v30 = vmul.f32 %v2563_v56, %v2815_v59  ;;  %v2863_v24 = vmul.f32 %v2815_v59, %v2587_v17  ;;  %v2867_v46 = vmul.f32 %v2582_v11, %v2815_v59  ;;  %v2871_v40 = vmul.f32 %v2815_v59, %v2603_v34 }
 0x146   :  { %v1616_v29 = vadd.f32 %v1600_v21, %v2843_v50  ;;  %v2876_v62 = vmul.f32 %v2594_v26, %v2815_v59  ;;  %v2880_v56 = vmul.f32 %v2815_v59, %v2615_v45  ;;  %v2884_v17 = vmul.f32 %v2610_v39, %v2815_v59 }
 0x147   :  { %v2888_v11 = vmul.f32 %v2815_v59, %v2497_v8  ;;  %v2892_v34 = vmul.f32 %v2491_v5, %v2815_v59  ;;  %v2896_v26 = vmul.f32 %v2815_v59, %v2515_v19  ;;  %v2900_v45 = vmul.f32 %v2507_v13, %v2815_v59 }
 0x148   :  { %vm1632_vm2 = vcmp.gt.f32.partialorder %v1616_v29, 0.0  ;;  %v1648_v54 = vmul.f32 -1.089, %v1616_v29  ;;  %v2904_v39 = vmul.f32 %v2815_v59, %v2534_v32  ;;  %v2908_v8 = vmul.f32 %v2525_v25, %v2815_v59 }
 0x149   :  { %v2912_v5 = vmul.f32 %v2815_v59, %v2554_v48  ;;  %v2916_v19 = vmul.f32 %v2545_v41, %v2815_v59  ;;  %v2920_v13 = vmul.f32 %v2815_v59, %v2574_v0  ;;  %v2924_v32 = vmul.f32 %v2565_v57, %v2815_v59  ;;  %v3368_v48 = vld [vmem:[#allocation5_spill] sm:$0xff]  ;;  %v3370_v0 = vld [vmem:[#allocation6_spill] sm:$0xff] }
 0x14a   :  { %v1664_v36 = vsel %vm1632_vm2, %v1616_v29, %v1648_v54  ;;  %v2928_v25 = vmul.f32 %v2815_v59, %v2589_v20  ;;  %v2932_v43 = vmul.f32 %v3368_v48, %v2815_v59  ;;  %v2936_v41 = vmul.f32 %v2815_v59, %v3369_v31  ;;  %v3371_v57 = vld [vmem:[#allocation9_spill] sm:$0xff]  ;;  %v3372_v20 = vld [vmem:[#allocation8_spill] sm:$0xff]  ;;  %v3385_v29 = vld [vmem:[#allocation30_spill] sm:$0xff] }
 0x14b   :  { %1680 = vst [vmem:[#allocation2 + $0x1f0] sm:$0xff] %v1664_v36  ;;  %v2940_v33 = vmul.f32 %v3370_v0, %v2815_v59  ;;  %v2944_v55 = vmul.f32 %v2815_v59, %v3371_v57  ;;  %v2948_v10 = vmul.f32 %v3372_v20, %v2815_v59  ;;  %v2952_v42 = vmul.f32 %v2815_v59, %v3373_v44  ;;  %v3387_v36 = vld [vmem:[#allocation36_spill] sm:$0xff]  ;;  %v3389_v31 = vld [vmem:[#allocation34_spill] sm:$0xff] }
 0x14c   :  { %v2956_v1 = vmul.f32 %v3374_v23, %v2815_v59  ;;  %v2960_v58 = vmul.f32 %v2815_v59, %v3375_v2  ;;  %v2964_v60 = vmul.f32 %v3376_v27, %v2815_v59  ;;  %v2968_v61 = vmul.f32 %v2815_v59, %v3377_v49  ;;  %v3391_v57 = vld [vmem:[#allocation40_spill] sm:$0xff]  ;;  %v3393_v44 = vld [vmem:[#allocation38_spill] sm:$0xff]  ;;  %v3395_v2 = vld [vmem:[#allocation13_spill] sm:$0xff] }
 0x14d   :  { %v2972_v3 = vmul.f32 %v3378_v47, %v2815_v59  ;;  %v2976_v15 = vmul.f32 %v2815_v59, %v3379_v28  ;;  %v2980_v53 = vmul.f32 %v3380_v51, %v2815_v59  ;;  %v2984_v37 = vmul.f32 %v2815_v59, %v3381_v22  ;;  %v3397_v49 = vld [vmem:[#allocation11_spill] sm:$0xff]  ;;  %v3399_v28 = vld [vmem:[#allocation17_spill] sm:$0xff] }
 0x14e   :  { %v2988_v35 = vmul.f32 %v3382_v14, %v2815_v59  ;;  %v2992_v21 = vmul.f32 %v2815_v59, %v3383_v16  ;;  %v2996_v54 = vmul.f32 %v3385_v29, %v2815_v59  ;;  %v3000_v48 = vmul.f32 %v2815_v59, %v3387_v36  ;;  %v3401_v22 = vld [vmem:[#allocation15_spill] sm:$0xff]  ;;  %v3403_v16 = vld [vmem:[#allocation21_spill] sm:$0xff] }
 0x14f   :  { %v3004_v0 = vmul.f32 %v3389_v31, %v2815_v59  ;;  %v3008_v20 = vmul.f32 %v2815_v59, %v3391_v57  ;;  %v3012_v23 = vmul.f32 %v3393_v44, %v2815_v59  ;;  %v3016_v27 = vmul.f32 %v2815_v59, %v3395_v2  ;;  %v3405_v36 = vld [vmem:[#allocation19_spill] sm:$0xff]  ;;  %v3407_v57 = vld [vmem:[#allocation25_spill] sm:$0xff] }
 0x150   :  { %3384 = vst [vmem:[#allocation5_spill] sm:$0xff] %v2992_v21  ;;  %3386 = vst [vmem:[#allocation7_spill] sm:$0xff] %v2996_v54  ;;  %v3020_v47 = vmul.f32 %v3397_v49, %v2815_v59  ;;  %v3024_v51 = vmul.f32 %v2815_v59, %v3399_v28  ;;  %v3028_v14 = vmul.f32 %v3401_v22, %v2815_v59  ;;  %v3409_v2 = vld [vmem:[#allocation23_spill] sm:$0xff]  ;;  %v3411_v28 = vld [vmem:[#allocation29_spill] sm:$0xff] }
 0x151   :  { %3388 = vst [vmem:[#allocation6_spill] sm:$0xff] %v3000_v48  ;;  %3390 = vst [vmem:[#allocation9_spill] sm:$0xff] %v3004_v0  ;;  %v3032_v29 = vmul.f32 %v2815_v59, %v3403_v16  ;;  %v3036_v31 = vmul.f32 %v3405_v36, %v2815_v59  ;;  %v3040_v44 = vmul.f32 %v2815_v59, %v3407_v57 }
 0x152   :  { %3392 = vst [vmem:[#allocation8_spill] sm:$0xff] %v3008_v20  ;;  %3394 = vst [vmem:[#allocation12_spill] sm:$0xff] %v3012_v23  ;;  %v3044_v49 = vmul.f32 %v3409_v2, %v2815_v59  ;;  %v3048_v22 = vmul.f32 %v2815_v59, %v3411_v28 }
 0x153   :  { %3396 = vst [vmem:[#allocation10_spill] sm:$0xff] %v3016_v27  ;;  %3398 = vst [vmem:[#allocation16_spill] sm:$0xff] %v3020_v47 }
 0x154   :  { %3400 = vst [vmem:[#allocation14_spill] sm:$0xff] %v3024_v51  ;;  %3402 = vst [vmem:[#allocation20_spill] sm:$0xff] %v3028_v14  ;;  %v3413_v14 = vld [vmem:[#allocation27_spill] sm:$0xff] }
 0x155   :  { %3404 = vst [vmem:[#allocation18_spill] sm:$0xff] %v3032_v29  ;;  %3406 = vst [vmem:[#allocation24_spill] sm:$0xff] %v3036_v31  ;;  %v3052_v16 = vmul.f32 %v3413_v14, %v2815_v59  ;;  %v3415_v29 = vld [vmem:[#allocation33_spill] sm:$0xff]  ;;  %v3417_v31 = vld [vmem:[#allocation31_spill] sm:$0xff] }
 0x156   :  { %3408 = vst [vmem:[#allocation22_spill] sm:$0xff] %v3040_v44  ;;  %3410 = vst [vmem:[#allocation28_spill] sm:$0xff] %v3044_v49  ;;  %v3056_v36 = vmul.f32 %v2815_v59, %v3415_v29  ;;  %v3060_v57 = vmul.f32 %v3417_v31, %v2815_v59  ;;  %v3419_v44 = vld [vmem:[#allocation37_spill] sm:$0xff]  ;;  %v3421_v49 = vld [vmem:[#allocation35_spill] sm:$0xff]  ;;  %v1266_v29 = vadd.f32 %v2843_v50, %v2821_v52 }
 0x157   :  { %3412 = vst [vmem:[#allocation26_spill] sm:$0xff] %v3048_v22  ;;  %3414 = vst [vmem:[#allocation32_spill] sm:$0xff] %v3052_v16  ;;  %v3064_v2 = vmul.f32 %v2815_v59, %v3419_v44  ;;  %v3068_v28 = vmul.f32 %v3421_v49, %v2815_v59  ;;  %v3423_v22 = vld [vmem:[#allocation39_spill] sm:$0xff]  ;;  %v1268_v31 = vadd.f32 %v2843_v50, %v2829_v6 }
 0x158   :  { %3416 = vst [vmem:[#allocation30_spill] sm:$0xff] %v3056_v36  ;;  %3418 = vst [vmem:[#allocation36_spill] sm:$0xff] %v3060_v57  ;;  %v3072_v14 = vmul.f32 %v3423_v22, %v2815_v59  ;;  %v1267_v36 = vadd.f32 %v2843_v50, %v2825_v9  ;;  %v1269_v44 = vadd.f32 %v2843_v50, %v2833_v63  ;;  %vm1282_vm3 = vcmp.gt.f32.partialorder %v1266_v29, 0.0 }
 0x159   :  { %3420 = vst [vmem:[#allocation34_spill] sm:$0xff] %v3064_v2  ;;  %3422 = vst [vmem:[#allocation40_spill] sm:$0xff] %v3068_v28  ;;  %v1270_v49 = vadd.f32 %v2843_v50, %v2837_v38  ;;  %v1271_v28 = vadd.f32 %v2843_v50, %v2841_v7  ;;  %v1272_v59 = vadd.f32 %v2843_v50, %v2847_v4  ;;  %vm1284_vm5 = vcmp.gt.f32.partialorder %v1268_v31, 0.0 }
 0x15a   :  { %3424 = vst [vmem:[#allocation38_spill] sm:$0xff] %v3072_v14  ;;  %v1273_v52 = vadd.f32 %v2843_v50, %v2851_v18  ;;  %v1274_v9 = vadd.f32 %v2843_v50, %v2855_v12  ;;  %v1275_v6 = vadd.f32 %v2843_v50, %v2859_v30  ;;  %v1276_v63 = vadd.f32 %v2843_v50, %v2863_v24 }
 0x15b   :  { %v1277_v38 = vadd.f32 %v2843_v50, %v2867_v46  ;;  %v1278_v7 = vadd.f32 %v2843_v50, %v2871_v40  ;;  %v1279_v4 = vadd.f32 %v2843_v50, %v2876_v62  ;;  %v1280_v18 = vadd.f32 %v2843_v50, %v2880_v56 }
 0x15c   :  { %v1281_v12 = vadd.f32 %v2843_v50, %v2884_v17  ;;  %vm1283_vm4 = vcmp.gt.f32.partialorder %v1267_v36, 0.0  ;;  %vm1285_vm6 = vcmp.gt.f32.partialorder %v1269_v44, 0.0  ;;  %vm1286_vm7 = vcmp.gt.f32.partialorder %v1270_v49, 0.0 }
 0x15d   :  { %vm1287_vm8 = vcmp.gt.f32.partialorder %v1271_v28, 0.0  ;;  %vm1288_vm9 = vcmp.gt.f32.partialorder %v1272_v59, 0.0  ;;  %vm1289_vm10 = vcmp.gt.f32.partialorder %v1273_v52, 0.0  ;;  %vm1290_vm11 = vcmp.gt.f32.partialorder %v1274_v9, 0.0 }
 0x15e   :  { %vm1291_vm12 = vcmp.gt.f32.partialorder %v1275_v6, 0.0  ;;  %vm1292_vm13 = vcmp.gt.f32.partialorder %v1276_v63, 0.0  ;;  %vm1293_vm14 = vcmp.gt.f32.partialorder %v1277_v38, 0.0  ;;  %vm1294_vm15 = vcmp.gt.f32.partialorder %v1278_v7, 0.0 }
 0x15f   :  { %vm1295_vm0 = vcmp.gt.f32.partialorder %v1279_v4, 0.0  ;;  %vm1296_vm1 = vcmp.gt.f32.partialorder %v1280_v18, 0.0  ;;  %vm1297_vm2 = vcmp.gt.f32.partialorder %v1281_v12, 0.0  ;;  %v1298_v30 = vmul.f32 -1.089, %v1266_v29 }
 0x160   :  { %v1299_v24 = vmul.f32 -1.089, %v1267_v36  ;;  %v1300_v46 = vmul.f32 -1.089, %v1268_v31  ;;  %v1301_v40 = vmul.f32 -1.089, %v1269_v44  ;;  %v3108_v56 = vadd.f32 %v2888_v11, %v2843_v50 }
 0x161   :  { %v1302_v62 = vmul.f32 -1.089, %v1270_v49  ;;  %v1303_v17 = vmul.f32 -1.089, %v1271_v28  ;;  %v1304_v22 = vmul.f32 -1.089, %v1272_v59  ;;  %v1314_v2 = vsel %vm1282_vm3, %v1266_v29, %v1298_v30 }
 0x162   :  { %v1305_v14 = vmul.f32 -1.089, %v1273_v52  ;;  %v1306_v57 = vmul.f32 -1.089, %v1274_v9  ;;  %v1307_v16 = vmul.f32 -1.089, %v1275_v6  ;;  %v1315_v47 = vsel %vm1283_vm4, %v1267_v36, %v1299_v24 }
 0x163   :  { %v1308_v51 = vmul.f32 -1.089, %v1276_v63  ;;  %1330 = vst [vmem:[#allocation2] sm:$0xff] %v1314_v2  ;;  %v1309_v27 = vmul.f32 -1.089, %v1277_v38  ;;  %v1316_v0 = vsel %vm1284_vm5, %v1268_v31, %v1300_v46  ;;  %1331 = vst [vmem:[#allocation2 + $0x8] sm:$0xff] %v1315_v47  ;;  %v1317_v54 = vsel %vm1285_vm6, %v1269_v44, %v1301_v40 }
 0x164   :  { %v1310_v23 = vmul.f32 -1.089, %v1278_v7  ;;  %v1311_v20 = vmul.f32 -1.089, %v1279_v4  ;;  %v1312_v48 = vmul.f32 -1.089, %v1280_v18  ;;  %v1318_v21 = vsel %vm1286_vm7, %v1270_v49, %v1302_v62 }
 0x165   :  { %v1313_v11 = vmul.f32 -1.089, %v1281_v12  ;;  %1332 = vst [vmem:[#allocation2 + $0x10] sm:$0xff] %v1316_v0  ;;  %v1319_v29 = vsel %vm1287_vm8, %v1271_v28, %v1303_v17  ;;  %v1320_v30 = vsel %vm1288_vm9, %v1272_v59, %v1304_v22  ;;  %v1321_v36 = vsel %vm1289_vm10, %v1273_v52, %v1305_v14  ;;  %1333 = vst [vmem:[#allocation2 + $0x18] sm:$0xff] %v1317_v54 }
 0x166   :  { %v1322_v2 = vsel %vm1290_vm11, %v1274_v9, %v1306_v57  ;;  %1334 = vst [vmem:[#allocation2 + $0x20] sm:$0xff] %v1318_v21  ;;  %v1323_v31 = vsel %vm1291_vm12, %v1275_v6, %v1307_v16  ;;  %v1324_v47 = vsel %vm1292_vm13, %v1276_v63, %v1308_v51  ;;  %v1325_v24 = vsel %vm1293_vm14, %v1277_v38, %v1309_v27 }
 0x167   :  { %v1326_v44 = vsel %vm1294_vm15, %v1278_v7, %v1310_v23  ;;  %1335 = vst [vmem:[#allocation2 + $0x28] sm:$0xff] %v1319_v29  ;;  %1336 = vst [vmem:[#allocation2 + $0x30] sm:$0xff] %v1320_v30  ;;  %v1327_v0 = vsel %vm1295_vm0, %v1279_v4, %v1311_v20  ;;  %v1328_v28 = vsel %vm1296_vm1, %v1280_v18, %v1312_v48  ;;  %vm1394_vm3 = vcmp.gt.f32.partialorder %v3108_v56, 0.0 }
 0x168   :  { %1337 = vst [vmem:[#allocation2 + $0x38] sm:$0xff] %v1321_v36  ;;  %1338 = vst [vmem:[#allocation2 + $0x40] sm:$0xff] %v1322_v2  ;;  %v1329_v57 = vsel %vm1297_vm2, %v1281_v12, %v1313_v11  ;;  %v1379_v21 = vadd.f32 %v2892_v34, %v2843_v50  ;;  %v1380_v54 = vadd.f32 %v2896_v26, %v2843_v50 }
 0x169   :  { %1339 = vst [vmem:[#allocation2 + $0x48] sm:$0xff] %v1323_v31  ;;  %1340 = vst [vmem:[#allocation2 + $0x50] sm:$0xff] %v1324_v47  ;;  %v1381_v20 = vadd.f32 %v2900_v45, %v2843_v50  ;;  %v1382_v48 = vadd.f32 %v2904_v39, %v2843_v50  ;;  %v1383_v23 = vadd.f32 %v2908_v8, %v2843_v50 }
 0x16a   :  { %1341 = vst [vmem:[#allocation2 + $0x58] sm:$0xff] %v1325_v24  ;;  %1342 = vst [vmem:[#allocation2 + $0x60] sm:$0xff] %v1326_v44  ;;  %v1384_v27 = vadd.f32 %v2912_v5, %v2843_v50  ;;  %v1385_v34 = vadd.f32 %v2916_v19, %v2843_v50  ;;  %v1386_v51 = vadd.f32 %v2920_v13, %v2843_v50  ;;  %vm1395_vm4 = vcmp.gt.f32.partialorder %v1379_v21, 0.0 }
 0x16b   :  { %1343 = vst [vmem:[#allocation2 + $0x68] sm:$0xff] %v1327_v0  ;;  %1344 = vst [vmem:[#allocation2 + $0x70] sm:$0xff] %v1328_v28  ;;  %v1387_v26 = vadd.f32 %v2924_v32, %v2843_v50  ;;  %v1388_v45 = vadd.f32 %v2928_v25, %v2843_v50  ;;  %v1389_v39 = vadd.f32 %v2932_v43, %v2843_v50  ;;  %vm1396_vm5 = vcmp.gt.f32.partialorder %v1380_v54, 0.0 }
 0x16c   :  { %1345 = vst [vmem:[#allocation2 + $0x78] sm:$0xff] %v1329_v57  ;;  %v1390_v8 = vadd.f32 %v2936_v41, %v2843_v50  ;;  %v1391_v5 = vadd.f32 %v2940_v33, %v2843_v50  ;;  %v1392_v19 = vadd.f32 %v2944_v55, %v2843_v50  ;;  %v1393_v13 = vadd.f32 %v2948_v10, %v2843_v50 }
 0x16d   :  { %vm1397_vm6 = vcmp.gt.f32.partialorder %v1381_v20, 0.0  ;;  %vm1398_vm7 = vcmp.gt.f32.partialorder %v1382_v48, 0.0  ;;  %vm1399_vm8 = vcmp.gt.f32.partialorder %v1383_v23, 0.0  ;;  %vm1400_vm9 = vcmp.gt.f32.partialorder %v1384_v27, 0.0 }
 0x16e   :  { %vm1401_vm10 = vcmp.gt.f32.partialorder %v1385_v34, 0.0  ;;  %vm1402_vm11 = vcmp.gt.f32.partialorder %v1386_v51, 0.0  ;;  %vm1403_vm12 = vcmp.gt.f32.partialorder %v1387_v26, 0.0  ;;  %vm1404_vm13 = vcmp.gt.f32.partialorder %v1388_v45, 0.0 }
 0x16f   :  { %vm1405_vm14 = vcmp.gt.f32.partialorder %v1389_v39, 0.0  ;;  %vm1406_vm15 = vcmp.gt.f32.partialorder %v1390_v8, 0.0  ;;  %vm1407_vm0 = vcmp.gt.f32.partialorder %v1391_v5, 0.0  ;;  %vm1408_vm1 = vcmp.gt.f32.partialorder %v1392_v19, 0.0 }
 0x170   :  { %vm1409_vm2 = vcmp.gt.f32.partialorder %v1393_v13, 0.0  ;;  %v1410_v32 = vmul.f32 -1.089, %v3108_v56  ;;  %v1411_v25 = vmul.f32 -1.089, %v1379_v21  ;;  %v3160_v55 = vadd.f32 %v2952_v42, %v2843_v50 }
 0x171   :  { %v1412_v43 = vmul.f32 -1.089, %v1380_v54  ;;  %v1413_v41 = vmul.f32 -1.089, %v1381_v20  ;;  %v1414_v33 = vmul.f32 -1.089, %v1382_v48  ;;  %v1491_v47 = vadd.f32 %v2956_v1, %v2843_v50 }
 0x172   :  { %v1415_v10 = vmul.f32 -1.089, %v1383_v23  ;;  %v1416_v16 = vmul.f32 -1.089, %v1384_v27  ;;  %v1417_v14 = vmul.f32 -1.089, %v1385_v34  ;;  %v1426_v49 = vsel %vm1394_vm3, %v3108_v56, %v1410_v32 }
 0x173   :  { %v1418_v59 = vmul.f32 -1.089, %v1386_v51  ;;  %v1419_v52 = vmul.f32 -1.089, %v1387_v26  ;;  %v1420_v9 = vmul.f32 -1.089, %v1388_v45  ;;  %v1427_v6 = vsel %vm1395_vm4, %v1379_v21, %v1411_v25 }
 0x174   :  { %1442 = vst [vmem:[#allocation2 + $0x80] sm:$0xff] %v1426_v49  ;;  %v1421_v63 = vmul.f32 -1.089, %v1389_v39  ;;  %v1422_v38 = vmul.f32 -1.089, %v1390_v8  ;;  %v1428_v4 = vsel %vm1396_vm5, %v1380_v54, %v1412_v43  ;;  %1443 = vst [vmem:[#allocation2 + $0x88] sm:$0xff] %v1427_v6  ;;  %v1429_v12 = vsel %vm1397_vm6, %v1381_v20, %v1413_v41 }
 0x175   :  { %v1423_v7 = vmul.f32 -1.089, %v1391_v5  ;;  %v1424_v42 = vmul.f32 -1.089, %v1392_v19  ;;  %v1425_v18 = vmul.f32 -1.089, %v1393_v13  ;;  %v1430_v46 = vsel %vm1398_vm7, %v1382_v48, %v1414_v33 }
 0x176   :  { %1444 = vst [vmem:[#allocation2 + $0x90] sm:$0xff] %v1428_v4  ;;  %v1431_v40 = vsel %vm1399_vm8, %v1383_v23, %v1415_v10  ;;  %v1432_v62 = vsel %vm1400_vm9, %v1384_v27, %v1416_v16  ;;  %v1433_v56 = vsel %vm1401_vm10, %v1385_v34, %v1417_v14  ;;  %v1434_v17 = vsel %vm1402_vm11, %v1386_v51, %v1418_v59 }
 0x177   :  { %1445 = vst [vmem:[#allocation2 + $0x98] sm:$0xff] %v1429_v12  ;;  %1446 = vst [vmem:[#allocation2 + $0xa0] sm:$0xff] %v1430_v46  ;;  %v1435_v22 = vsel %vm1403_vm12, %v1387_v26, %v1419_v52  ;;  %v1436_v11 = vsel %vm1404_vm13, %v1388_v45, %v1420_v9  ;;  %v1437_v29 = vsel %vm1405_vm14, %v1389_v39, %v1421_v63  ;;  %vm1506_vm3 = vcmp.gt.f32.partialorder %v3160_v55, 0.0 }
 0x178   :  { %v1438_v30 = vsel %vm1406_vm15, %v1390_v8, %v1422_v38  ;;  %1447 = vst [vmem:[#allocation2 + $0xa8] sm:$0xff] %v1431_v40  ;;  %1448 = vst [vmem:[#allocation2 + $0xb0] sm:$0xff] %v1432_v62  ;;  %v1439_v36 = vsel %vm1407_vm0, %v1391_v5, %v1423_v7  ;;  %v1440_v2 = vsel %vm1408_vm1, %v1392_v19, %v1424_v42  ;;  %vm1507_vm4 = vcmp.gt.f32.partialorder %v1491_v47, 0.0  ;;  %v3431_v8 = vld [vmem:[#allocation10_spill] sm:$0xff] }
 0x179   :  { %1449 = vst [vmem:[#allocation2 + $0xb8] sm:$0xff] %v1433_v56  ;;  %1450 = vst [vmem:[#allocation2 + $0xc0] sm:$0xff] %v1434_v17  ;;  %v1441_v31 = vsel %vm1409_vm2, %v1393_v13, %v1425_v18  ;;  %v1492_v24 = vadd.f32 %v2960_v58, %v2843_v50  ;;  %v1493_v44 = vadd.f32 %v2964_v60, %v2843_v50  ;;  %v3425_v60 = vld [vmem:[#allocation5_spill] sm:$0xff]  ;;  %v1523_v51 = vmul.f32 -1.089, %v1491_v47  ;;  %v3432_v17 = vld [vmem:[#allocation16_spill] sm:$0xff] }
 0x17a   :  { %1451 = vst [vmem:[#allocation2 + $0xc8] sm:$0xff] %v1435_v22  ;;  %1452 = vst [vmem:[#allocation2 + $0xd0] sm:$0xff] %v1436_v11  ;;  %v1494_v0 = vadd.f32 %v2968_v61, %v2843_v50  ;;  %v1495_v28 = vadd.f32 %v2972_v3, %v2843_v50  ;;  %v1496_v57 = vadd.f32 %v2976_v15, %v2843_v50  ;;  %v3426_v61 = vld [vmem:[#allocation7_spill] sm:$0xff]  ;;  %v3427_v3 = vld [vmem:[#allocation6_spill] sm:$0xff] }
 0x17b   :  { %1453 = vst [vmem:[#allocation2 + $0xd8] sm:$0xff] %v1437_v29  ;;  %1454 = vst [vmem:[#allocation2 + $0xe0] sm:$0xff] %v1438_v30  ;;  %v1497_v1 = vadd.f32 %v2980_v53, %v2843_v50  ;;  %v1498_v21 = vadd.f32 %v2984_v37, %v2843_v50  ;;  %v1499_v58 = vadd.f32 %v2988_v35, %v2843_v50  ;;  %v3428_v15 = vld [vmem:[#allocation9_spill] sm:$0xff]  ;;  %v3429_v53 = vld [vmem:[#allocation8_spill] sm:$0xff]  ;;  %vm1508_vm5 = vcmp.gt.f32.partialorder %v1492_v24, 0.0 }
 0x17c   :  { %1455 = vst [vmem:[#allocation2 + $0xe8] sm:$0xff] %v1439_v36  ;;  %1456 = vst [vmem:[#allocation2 + $0xf0] sm:$0xff] %v1440_v2  ;;  %v1500_v54 = vadd.f32 %v3425_v60, %v2843_v50  ;;  %v1501_v20 = vadd.f32 %v3426_v61, %v2843_v50  ;;  %v1502_v48 = vadd.f32 %v3427_v3, %v2843_v50  ;;  %v3430_v37 = vld [vmem:[#allocation12_spill] sm:$0xff]  ;;  %vm1509_vm6 = vcmp.gt.f32.partialorder %v1493_v44, 0.0  ;;  %v3433_v11 = vld [vmem:[#allocation14_spill] sm:$0xff] }
 0x17d   :  { %1457 = vst [vmem:[#allocation2 + $0xf8] sm:$0xff] %v1441_v31  ;;  %v1503_v23 = vadd.f32 %v3428_v15, %v2843_v50  ;;  %v1504_v27 = vadd.f32 %v3429_v53, %v2843_v50  ;;  %v1505_v34 = vadd.f32 %v3430_v37, %v2843_v50  ;;  %vm1510_vm7 = vcmp.gt.f32.partialorder %v1494_v0, 0.0  ;;  %v3434_v30 = vld [vmem:[#allocation20_spill] sm:$0xff]  ;;  %v3435_v2 = vld [vmem:[#allocation18_spill] sm:$0xff] }
 0x17e   :  { %vm1511_vm8 = vcmp.gt.f32.partialorder %v1495_v28, 0.0  ;;  %vm1512_vm9 = vcmp.gt.f32.partialorder %v1496_v57, 0.0  ;;  %vm1513_vm10 = vcmp.gt.f32.partialorder %v1497_v1, 0.0  ;;  %vm1514_vm11 = vcmp.gt.f32.partialorder %v1498_v21, 0.0 }
 0x17f   :  { %vm1515_vm12 = vcmp.gt.f32.partialorder %v1499_v58, 0.0  ;;  %vm1516_vm13 = vcmp.gt.f32.partialorder %v1500_v54, 0.0  ;;  %vm1517_vm14 = vcmp.gt.f32.partialorder %v1501_v20, 0.0  ;;  %vm1518_vm15 = vcmp.gt.f32.partialorder %v1502_v48, 0.0 }
 0x180   :  { %vm1519_vm0 = vcmp.gt.f32.partialorder %v1503_v23, 0.0  ;;  %vm1520_vm1 = vcmp.gt.f32.partialorder %v1504_v27, 0.0  ;;  %vm1521_vm2 = vcmp.gt.f32.partialorder %v1505_v34, 0.0  ;;  %v1522_v35 = vmul.f32 -1.089, %v3160_v55 }
 0x181   :  { %v1524_v26 = vmul.f32 -1.089, %v1492_v24  ;;  %v1525_v45 = vmul.f32 -1.089, %v1493_v44  ;;  %v1526_v39 = vmul.f32 -1.089, %v1494_v0  ;;  %v3214_v5 = vadd.f32 %v3431_v8, %v2843_v50 }
 0x182   :  { %v1527_v19 = vmul.f32 -1.089, %v1495_v28  ;;  %v1528_v13 = vmul.f32 -1.089, %v1496_v57  ;;  %v1529_v32 = vmul.f32 -1.089, %v1497_v1  ;;  %v1538_v25 = vsel %vm1506_vm3, %v3160_v55, %v1522_v35 }
 0x183   :  { %v1530_v43 = vmul.f32 -1.089, %v1498_v21  ;;  %v1531_v41 = vmul.f32 -1.089, %v1499_v58  ;;  %v1532_v33 = vmul.f32 -1.089, %v1500_v54  ;;  %v1539_v10 = vsel %vm1507_vm4, %v1491_v47, %v1523_v51 }
 0x184   :  { %1554 = vst [vmem:[#allocation2 + $0x100] sm:$0xff] %v1538_v25  ;;  %v1533_v16 = vmul.f32 -1.089, %v1501_v20  ;;  %v1534_v14 = vmul.f32 -1.089, %v1502_v48  ;;  %v1540_v59 = vsel %vm1508_vm5, %v1492_v24, %v1524_v26  ;;  %1555 = vst [vmem:[#allocation2 + $0x108] sm:$0xff] %v1539_v10  ;;  %v1541_v6 = vsel %vm1509_vm6, %v1493_v44, %v1525_v45 }
 0x185   :  { %v1535_v49 = vmul.f32 -1.089, %v1503_v23  ;;  %v1536_v52 = vmul.f32 -1.089, %v1504_v27  ;;  %v1537_v9 = vmul.f32 -1.089, %v1505_v34  ;;  %v1542_v63 = vsel %vm1510_vm7, %v1494_v0, %v1526_v39 }
 0x186   :  { %1556 = vst [vmem:[#allocation2 + $0x110] sm:$0xff] %v1540_v59  ;;  %v1543_v55 = vsel %vm1511_vm8, %v1495_v28, %v1527_v19  ;;  %v1544_v38 = vsel %vm1512_vm9, %v1496_v57, %v1528_v13  ;;  %v1545_v7 = vsel %vm1513_vm10, %v1497_v1, %v1529_v32  ;;  %v1546_v4 = vsel %vm1514_vm11, %v1498_v21, %v1530_v43  ;;  %v3436_v47 = vld [vmem:[#allocation24_spill] sm:$0xff]  ;;  %v3437_v44 = vld [vmem:[#allocation22_spill] sm:$0xff] }
 0x187   :  { %1557 = vst [vmem:[#allocation2 + $0x118] sm:$0xff] %v1541_v6  ;;  %1558 = vst [vmem:[#allocation2 + $0x120] sm:$0xff] %v1542_v63  ;;  %v1547_v42 = vsel %vm1515_vm12, %v1499_v58, %v1531_v41  ;;  %v1548_v18 = vsel %vm1516_vm13, %v1500_v54, %v1532_v33  ;;  %v1549_v12 = vsel %vm1517_vm14, %v1501_v20, %v1533_v16  ;;  %v3438_v28 = vld [vmem:[#allocation28_spill] sm:$0xff]  ;;  %v3439_v1 = vld [vmem:[#allocation26_spill] sm:$0xff]  ;;  %vm1618_vm3 = vcmp.gt.f32.partialorder %v3214_v5, 0.0 }
 0x188   :  { %v1550_v46 = vsel %vm1518_vm15, %v1502_v48, %v1534_v14  ;;  %1559 = vst [vmem:[#allocation2 + $0x128] sm:$0xff] %v1543_v55  ;;  %1560 = vst [vmem:[#allocation2 + $0x130] sm:$0xff] %v1544_v38  ;;  %v1551_v40 = vsel %vm1519_vm0, %v1503_v23, %v1535_v49  ;;  %v1552_v62 = vsel %vm1520_vm1, %v1504_v27, %v1536_v52  ;;  %v3440_v58 = vld [vmem:[#allocation32_spill] sm:$0xff]  ;;  %v3441_v54 = vld [vmem:[#allocation30_spill] sm:$0xff] }
 0x189   :  { %1561 = vst [vmem:[#allocation2 + $0x138] sm:$0xff] %v1545_v7  ;;  %1562 = vst [vmem:[#allocation2 + $0x140] sm:$0xff] %v1546_v4  ;;  %v1553_v56 = vsel %vm1521_vm2, %v1505_v34, %v1537_v9  ;;  %v1603_v22 = vadd.f32 %v3432_v17, %v2843_v50  ;;  %v1604_v29 = vadd.f32 %v3433_v11, %v2843_v50  ;;  %v3442_v20 = vld [vmem:[#allocation36_spill] sm:$0xff]  ;;  %v3443_v48 = vld [vmem:[#allocation34_spill] sm:$0xff] }
 0x18a   :  { %1563 = vst [vmem:[#allocation2 + $0x148] sm:$0xff] %v1547_v42  ;;  %1564 = vst [vmem:[#allocation2 + $0x150] sm:$0xff] %v1548_v18  ;;  %v1605_v36 = vadd.f32 %v3434_v30, %v2843_v50  ;;  %v1606_v31 = vadd.f32 %v3435_v2, %v2843_v50  ;;  %v1607_v24 = vadd.f32 %v3436_v47, %v2843_v50  ;;  %v3444_v23 = vld [vmem:[#allocation40_spill] sm:$0xff]  ;;  %v3445_v27 = vld [vmem:[#allocation38_spill] sm:$0xff] }
 0x18b   :  { %1565 = vst [vmem:[#allocation2 + $0x158] sm:$0xff] %v1549_v12  ;;  %1566 = vst [vmem:[#allocation2 + $0x160] sm:$0xff] %v1550_v46  ;;  %v1608_v0 = vadd.f32 %v3437_v44, %v2843_v50  ;;  %v1609_v57 = vadd.f32 %v3438_v28, %v2843_v50  ;;  %v1610_v21 = vadd.f32 %v3439_v1, %v2843_v50  ;;  %vm1619_vm4 = vcmp.gt.f32.partialorder %v1603_v22, 0.0 }
 0x18c   :  { %1567 = vst [vmem:[#allocation2 + $0x168] sm:$0xff] %v1551_v40  ;;  %1568 = vst [vmem:[#allocation2 + $0x170] sm:$0xff] %v1552_v62  ;;  %v1611_v60 = vadd.f32 %v3440_v58, %v2843_v50  ;;  %v1612_v61 = vadd.f32 %v3441_v54, %v2843_v50  ;;  %v1613_v3 = vadd.f32 %v3442_v20, %v2843_v50  ;;  %vm1620_vm5 = vcmp.gt.f32.partialorder %v1604_v29, 0.0 }
 0x18d   :  { %1569 = vst [vmem:[#allocation2 + $0x178] sm:$0xff] %v1553_v56  ;;  %v1614_v15 = vadd.f32 %v3443_v48, %v2843_v50  ;;  %v1615_v53 = vadd.f32 %v3444_v23, %v2843_v50  ;;  %v1617_v37 = vadd.f32 %v3445_v27, %v2843_v50  ;;  %vm1621_vm6 = vcmp.gt.f32.partialorder %v1605_v36, 0.0 }
 0x18e   :  { %vm1622_vm7 = vcmp.gt.f32.partialorder %v1606_v31, 0.0  ;;  %vm1623_vm8 = vcmp.gt.f32.partialorder %v1607_v24, 0.0  ;;  %vm1624_vm9 = vcmp.gt.f32.partialorder %v1608_v0, 0.0  ;;  %vm1625_vm10 = vcmp.gt.f32.partialorder %v1609_v57, 0.0 }
 0x18f   :  { %vm1626_vm11 = vcmp.gt.f32.partialorder %v1610_v21, 0.0  ;;  %vm1627_vm12 = vcmp.gt.f32.partialorder %v1611_v60, 0.0  ;;  %vm1628_vm13 = vcmp.gt.f32.partialorder %v1612_v61, 0.0  ;;  %vm1629_vm14 = vcmp.gt.f32.partialorder %v1613_v3, 0.0 }
 0x190   :  { %vm1630_vm15 = vcmp.gt.f32.partialorder %v1614_v15, 0.0  ;;  %vm1631_vm0 = vcmp.gt.f32.partialorder %v1615_v53, 0.0  ;;  %vm1633_vm1 = vcmp.gt.f32.partialorder %v1617_v37, 0.0  ;;  %v1634_v50 = vmul.f32 -1.089, %v3214_v5 }
 0x191   :  { %v1635_v34 = vmul.f32 -1.089, %v1603_v22  ;;  %v1636_v35 = vmul.f32 -1.089, %v1604_v29  ;;  %v1637_v51 = vmul.f32 -1.089, %v1605_v36 }
 0x192   :  { %v1638_v26 = vmul.f32 -1.089, %v1606_v31  ;;  %v1639_v45 = vmul.f32 -1.089, %v1607_v24  ;;  %v1640_v39 = vmul.f32 -1.089, %v1608_v0  ;;  %v1650_v13 = vsel %vm1618_vm3, %v3214_v5, %v1634_v50 }
 0x193   :  { %v1641_v8 = vmul.f32 -1.089, %v1609_v57  ;;  %v1642_v19 = vmul.f32 -1.089, %v1610_v21  ;;  %v1643_v32 = vmul.f32 -1.089, %v1611_v60  ;;  %v1651_v41 = vsel %vm1619_vm4, %v1603_v22, %v1635_v34 }
 0x194   :  { %v1644_v25 = vmul.f32 -1.089, %v1612_v61  ;;  %v1645_v43 = vmul.f32 -1.089, %v1613_v3  ;;  %1666 = vst [vmem:[#allocation2 + $0x180] sm:$0xff] %v1650_v13  ;;  %v1652_v14 = vsel %vm1620_vm5, %v1604_v29, %v1636_v35  ;;  %1667 = vst [vmem:[#allocation2 + $0x188] sm:$0xff] %v1651_v41  ;;  %v1653_v49 = vsel %vm1621_vm6, %v1605_v36, %v1637_v51 }
 0x195   :  { %v1646_v33 = vmul.f32 -1.089, %v1614_v15  ;;  %v1647_v10 = vmul.f32 -1.089, %v1615_v53  ;;  %v1649_v16 = vmul.f32 -1.089, %v1617_v37  ;;  %v1654_v59 = vsel %vm1622_vm7, %v1606_v31, %v1638_v26 }
 0x196   :  { %v1655_v52 = vsel %vm1623_vm8, %v1607_v24, %v1639_v45  ;;  %v1656_v5 = vsel %vm1624_vm9, %v1608_v0, %v1640_v39  ;;  %1668 = vst [vmem:[#allocation2 + $0x190] sm:$0xff] %v1652_v14  ;;  %v1657_v9 = vsel %vm1625_vm10, %v1609_v57, %v1641_v8  ;;  %v1658_v6 = vsel %vm1626_vm11, %v1610_v21, %v1642_v19 }
 0x197   :  { %v1659_v63 = vsel %vm1627_vm12, %v1611_v60, %v1643_v32  ;;  %v1660_v55 = vsel %vm1628_vm13, %v1612_v61, %v1644_v25  ;;  %1669 = vst [vmem:[#allocation2 + $0x198] sm:$0xff] %v1653_v49  ;;  %1670 = vst [vmem:[#allocation2 + $0x1a0] sm:$0xff] %v1654_v59  ;;  %v1661_v38 = vsel %vm1629_vm14, %v1613_v3, %v1645_v43 }
 0x198   :  { %1671 = vst [vmem:[#allocation2 + $0x1a8] sm:$0xff] %v1655_v52  ;;  %1672 = vst [vmem:[#allocation2 + $0x1b0] sm:$0xff] %v1656_v5  ;;  %v1662_v7 = vsel %vm1630_vm15, %v1614_v15, %v1646_v33  ;;  %v1663_v4 = vsel %vm1631_vm0, %v1615_v53, %v1647_v10  ;;  %v1665_v42 = vsel %vm1633_vm1, %v1617_v37, %v1649_v16 }
 0x199   :  { %1673 = vst [vmem:[#allocation2 + $0x1b8] sm:$0xff] %v1657_v9  ;;  %1674 = vst [vmem:[#allocation2 + $0x1c0] sm:$0xff] %v1658_v6 }
 0x19a   :  { %1675 = vst [vmem:[#allocation2 + $0x1c8] sm:$0xff] %v1659_v63  ;;  %1676 = vst [vmem:[#allocation2 + $0x1d0] sm:$0xff] %v1660_v55 }
 0x19b   :  { %1677 = vst [vmem:[#allocation2 + $0x1d8] sm:$0xff] %v1661_v38  ;;  %1678 = vst [vmem:[#allocation2 + $0x1e0] sm:$0xff] %v1662_v7 }
 0x19c   :  { %1679 = vst [vmem:[#allocation2 + $0x1e8] sm:$0xff] %v1663_v4  ;;  %1681 = vst [vmem:[#allocation2 + $0x1f8] sm:$0xff] %v1665_v42 }
 0x19d   :  { %2094 = shalt.err (!%p2091_p4)
}
 0x19e   :  { %s2106_s24 = smov 128   ;;  %s2107_s25 = smov 8  }
 0x19f   :  { %1693 = dma.vmem_to_hbm [thread:$0]  %s3273_s3, 8192, %s3295_s4, [#allocation3], %s2106_s24, %s2106_s24, %s2107_s25  }
 0x1a0   :  { %2103 = dma.done.wait [#allocation3], 8192  }
 0x1a1   :  { %2104 = vsyncadd [#allocation3], 4294959104 }
 0x1a2   :  { %1697 = vsyncpa [#allocation3], 1 }

</bundles_post_ra>
